<compile_context>
chip_gen: v5e
topology: v5e:2x2
jax: 0.10.0
libtpu: 0.0.40
codegen_flags: <defaults>
</compile_context>

<pallas_src>
import math
import jax
import jax.numpy as jnp
from jax.experimental import pallas as pl
from jax.experimental.pallas import tpu as pltpu

# ------------------------------- configuration --------------------------------
DIM       = 128
N_HEADS   = 4
HEAD_DIM  = DIM // N_HEADS                                    # 32
SEQ       = 16
BATCH     = 2
EPS       = 1e-5
HIDDEN    = 256 * ((int(2 * 4 * DIM / 3) + 256 - 1) // 256)   # 512 (swiglu hidden)
LAYER_ID  = 0
MXU_DTYPE = jnp.bfloat16   # MXU operand dtype (f32 accumulation); norms/softmax stay f32


def _pick_gate_dtype():
    # bf16 elementwise is native on v6e/v7x; keep f32 on v5e/older (no bf16 VPU/EUP).
    try:
        kind = jax.devices()[0].device_kind.lower()
    except Exception:
        return jnp.float32
    if "v6" in kind or "v7" in kind or "7x" in kind:
        return jnp.bfloat16
    return jnp.float32


GATE_DTYPE = _pick_gate_dtype()


# ------------------------------ in-kernel helpers ------------------------------
def _layernorm_f32(x, g, b):
    mean = jnp.mean(x, axis=-1, keepdims=True)
    var = jnp.mean(jnp.square(x - mean), axis=-1, keepdims=True)
    return (x - mean) * jax.lax.rsqrt(var + EPS) * g + b


def _mm(a, w):
    # bf16 operands -> MXU, f32 accumulation.
    return jnp.dot(a.astype(MXU_DTYPE), w.astype(MXU_DTYPE),
                   preferred_element_type=jnp.float32)


# ------------------------------ fused block kernel -----------------------------
def _block_kernel(x_ref, cos_ref, sin_ref, rot_ref, bias_ref,
                  ag_ref, ab_ref, wqkv_ref, wout_ref,
                  fg_ref, fb_ref, w12_ref, w3_ref,
                  o_ref):
    S, D = x_ref.shape
    H = N_HEADS
    Dh = D // H
    hidden = w3_ref.shape[0]

    x = x_ref[...]                                           # (S, D) f32, one batch element

    # ---------------- attention branch ----------------
    h_ln = _layernorm_f32(x, ag_ref[...], ab_ref[...])
    qkv = _mm(h_ln, wqkv_ref[...])                           # (S, 3D) f32

    q = qkv[:, :D]                                           # 128-lane-aligned slices
    k = qkv[:, D:2 * D]
    v = qkv[:, 2 * D:]

    cos = cos_ref[...]                                       # (S, D) lane-dense tables
    sin = sin_ref[...]
    rotm = rot_ref[...]                                      # (D, D) +/-1 rotate-half matrix

    def rope(t):                                             # full-width (S, D) RoPE
        # rotate-half per 32-lane head block, done as one tiny MXU matmul (MXU has slack,
        # VPU/XLU is the bottleneck), then lane-dense cos/sin multiplies.
        return t * cos + _mm(t, rotm) * sin

    q = rope(q)
    k = rope(k)

    # Head-batched attention: stack heads into a leading batch dim once.
    qh = jnp.stack([q[:, h * Dh:(h + 1) * Dh] for h in range(H)], axis=0)   # (H, S, Dh)
    kh = jnp.stack([k[:, h * Dh:(h + 1) * Dh] for h in range(H)], axis=0)
    vh = jnp.stack([v[:, h * Dh:(h + 1) * Dh] for h in range(H)], axis=0)

    scale = 1.0 / math.sqrt(Dh)
    s = jax.lax.dot_general(                                  # (H, S, S) scores
        qh.astype(MXU_DTYPE), kh.astype(MXU_DTYPE),
        dimension_numbers=(((2,), (2,)), ((0,), (0,))),
        preferred_element_type=jnp.float32) * scale
    s = s + bias_ref[...][None, :, :]                         # precomputed additive causal mask

    m = jnp.max(s, axis=-1, keepdims=True)                    # f32 softmax
    p = jnp.exp(s - m)
    p = p * pl.reciprocal(jnp.sum(p, axis=-1, keepdims=True), approx=True)

    oh = jax.lax.dot_general(                                 # (H, S, Dh)
        p.astype(MXU_DTYPE), vh.astype(MXU_DTYPE),
        dimension_numbers=(((2,), (1,)), ((0,), (0,))),
        preferred_element_type=jnp.float32)

    attn = jnp.concatenate([oh[h] for h in range(H)], axis=-1)   # (S, D) lane-dense slab
    h_res = x + _mm(attn, wout_ref[...])                         # single K=128 out-projection

    # ---------------- SwiGLU feed-forward ----------------
    h_ln2 = _layernorm_f32(h_res, fg_ref[...], fb_ref[...])
    x12 = _mm(h_ln2, w12_ref[...])                            # (S, 2*hidden) f32
    x1 = x12[:, :hidden].astype(GATE_DTYPE)                   # lane-aligned 512-wide slices
    x2 = x12[:, hidden:].astype(GATE_DTYPE)
    hid = (x1 * jax.nn.sigmoid(x1)) * x2                      # silu(x1) * x2
    ff = _mm(hid, w3_ref[...])                                # (S, D)

    o_ref[...] = h_res + ff                                   # residual 2


# ----------------------------- constant table helpers ---------------------------
def rotate_half_matrix(dim, head_dim):
    """(dim, dim) matrix R with (t @ R) == rotate_half(t) per contiguous head block."""
    half = head_dim // 2
    j = jnp.arange(dim)[:, None]
    l = jnp.arange(dim)[None, :]
    same_head = (j // head_dim) == (l // head_dim)
    pj = j % head_dim
    pl_ = l % head_dim
    plus = same_head & (pl_ == pj + half)    # R[base+i, base+half+i] = +1
    minus = same_head & (pl_ + half == pj)   # R[base+half+i, base+i] = -1
    return jnp.where(plus, 1.0, 0.0) - jnp.where(minus, 1.0, 0.0)


def rotary_tables(seq_len, head_dim):
    inv_freq = 1.0 / (10000.0 ** (jnp.arange(0, head_dim, 2, dtype=jnp.float32) / head_dim))
    t = jnp.arange(seq_len, dtype=jnp.float32)
    freqs = jnp.outer(t, inv_freq)                           # (S, Dh/2)
    emb = jnp.concatenate([freqs, freqs], axis=-1)           # (S, Dh)
    return jnp.cos(emb), jnp.sin(emb)


# ---------------------------------- wrapper ------------------------------------
def block_forward(params, x, cos, sin):
    """Fused forward of one transformer Block. x: (B, S, D) f32 -> (B, S, D) f32."""
    B, S, D = x.shape
    x2d = x.reshape(B * S, D)

    # Lane-dense RoPE tables: tile the per-head (S, Dh) cos/sin across the 4 head blocks.
    cos_t = jnp.tile(cos, (1, N_HEADS)).astype(jnp.float32)          # (S, D)
    sin_t = jnp.tile(sin, (1, N_HEADS)).astype(jnp.float32)          # (S, D)
    rope_rot = rotate_half_matrix(D, HEAD_DIM).astype(MXU_DTYPE)     # (D, D)
    causal = jnp.where(
        jax.lax.broadcasted_iota(jnp.int32, (S, S), 0) >=
        jax.lax.broadcasted_iota(jnp.int32, (S, S), 1),
        0.0, -1e30).astype(jnp.float32)                              # additive mask

    def const_spec(shape):                                   # weights/tables: VMEM-resident
        return pl.BlockSpec(shape, lambda b: (0,) * len(shape))

    row_spec = pl.BlockSpec((S, D), lambda b: (b, 0))        # one batch element per step

    out = pl.pallas_call(
        _block_kernel,
        out_shape=jax.ShapeDtypeStruct((B * S, D), jnp.float32),
        grid=(B,),
        in_specs=[
            row_spec,                           # x
            const_spec((S, D)),                 # cos (tiled)
            const_spec((S, D)),                 # sin (tiled)
            const_spec((D, D)),                 # rotate-half matrix
            const_spec((S, S)),                 # causal additive bias
            const_spec((1, D)), const_spec((1, D)),   # attention_norm gamma / beta
            const_spec((D, 3 * D)),             # in_proj
            const_spec((D, D)),                 # out_proj
            const_spec((1, D)), const_spec((1, D)),   # ffn_norm gamma / beta
            const_spec((D, 2 * HIDDEN)),        # w12
            const_spec((HIDDEN, D)),            # w3
        ],
        out_specs=row_spec,
        compiler_params=pltpu.CompilerParams(dimension_semantics=("parallel",)),
        cost_estimate=pl.CostEstimate(flops=20_000_000, transcendentals=20_000,
                                      bytes_accessed=700_000),
    )(x2d, cos_t, sin_t, rope_rot, causal,
      params["attn_norm_g"], params["attn_norm_b"],
      params["in_proj_w"], params["out_proj_w"],
      params["ffn_norm_g"], params["ffn_norm_b"],
      params["w12"], params["w3"])
    return out.reshape(B, S, D)


# -------------------------- pure-JAX reference (f32) ---------------------------
def block_reference(params, x, cos, sin):
    B, S, D = x.shape
    f32 = lambda a: a.astype(jnp.float32)
    xf = x.reshape(B * S, D)

    hn = _layernorm_f32(xf, params["attn_norm_g"], params["attn_norm_b"])
    qkv = hn @ f32(params["in_proj_w"])
    q, k, v = jnp.split(qkv, 3, axis=-1)
    q = q.reshape(B, S, N_HEADS, HEAD_DIM)
    k = k.reshape(B, S, N_HEADS, HEAD_DIM)
    v = v.reshape(B, S, N_HEADS, HEAD_DIM)

    def rope4(t):
        half = HEAD_DIM // 2
        t1, t2 = t[..., :half], t[..., half:]
        rot = jnp.concatenate([-t2, t1], axis=-1)
        return t * cos[None, :, None, :] + rot * sin[None, :, None, :]
    q, k = rope4(q), rope4(k)

    scale = 1.0 / math.sqrt(HEAD_DIM)
    s = jnp.einsum("bqhd,bkhd->bhqk", q, k) * scale
    mask = jnp.tril(jnp.ones((S, S), bool))
    s = jnp.where(mask[None, None], s, -jnp.inf)
    p = jax.nn.softmax(s, axis=-1)
    o = jnp.einsum("bhqk,bkhd->bqhd", p, v).reshape(B * S, D)
    h = xf + o @ f32(params["out_proj_w"])

    hn2 = _layernorm_f32(h, params["ffn_norm_g"], params["ffn_norm_b"])
    x12 = hn2 @ f32(params["w12"])
    x1, x2 = jnp.split(x12, 2, axis=-1)
    ff = (jax.nn.silu(x1) * x2) @ f32(params["w3"])
    return (h + ff).reshape(B, S, D)


# ---------------------------- deterministic init -------------------------------
def trunc_normal(key, shape, std):
    # matches torch.nn.init.trunc_normal_(std=std, a=-3*std, b=3*std)
    return std * jax.random.truncated_normal(key, -3.0, 3.0, shape, dtype=jnp.float32)


def init_params(key, layer_id=LAYER_ID):
    k0, k1, k2, k3 = jax.random.split(key, 4)
    std_d = 1.0 / math.sqrt(DIM)
    std_out = std_d / math.sqrt(2 * (layer_id + 1))
    std_w3 = (1.0 / math.sqrt(HIDDEN)) / math.sqrt(2 * (layer_id + 1))
    return {
        # nn.Linear stores (out, in); transposed to (in, out) so y = x @ w.
        "in_proj_w":  trunc_normal(k0, (3 * DIM, DIM), std_d).T.astype(MXU_DTYPE),
        "out_proj_w": trunc_normal(k1, (DIM, DIM), std_out).T.astype(MXU_DTYPE),
        "w12":        trunc_normal(k2, (2 * HIDDEN, DIM), std_d).T.astype(MXU_DTYPE),
        "w3":         trunc_normal(k3, (DIM, HIDDEN), std_w3).T.astype(MXU_DTYPE),
        "attn_norm_g": jnp.ones((1, DIM), jnp.float32),
        "attn_norm_b": jnp.zeros((1, DIM), jnp.float32),
        "ffn_norm_g":  jnp.ones((1, DIM), jnp.float32),
        "ffn_norm_b":  jnp.zeros((1, DIM), jnp.float32),
    }


# ------------------------------------ main --------------------------------------
if __name__ == "__main__":
    key = jax.random.PRNGKey(0)
    pkey, xkey = jax.random.split(key)
    params = init_params(pkey)
    x = jax.random.normal(xkey, (BATCH, SEQ, DIM), dtype=jnp.float32)
    cos, sin = rotary_tables(SEQ, HEAD_DIM)

    fwd = jax.jit(block_forward)
    out = fwd(params, x, cos, sin)
    jax.block_until_ready(out)

    assert out.shape == (BATCH, SEQ, DIM) and out.dtype == jnp.float32
    assert bool(jnp.all(jnp.isfinite(out)))

    ref = block_reference(params, x, cos, sin)
    max_err = float(jnp.max(jnp.abs(out - ref)))
    # tolerance accounts for bf16 MXU operands in the kernel (f32 accumulation).
    assert bool(jnp.allclose(out, ref, rtol=1e-1, atol=1e-1)), f"max |err| = {max_err}"

    print("KERNEL_OK")
</pallas_src>

<mosaic_0001>
module attributes {stable_mosaic.version = 11 : i64} {
  func.func @_block_kernel(%arg0: i32, %arg1: memref<16x128xf32, #tpu.memory_space<vmem>>, %arg2: memref<16x128xf32, #tpu.memory_space<vmem>>, %arg3: memref<16x128xf32, #tpu.memory_space<vmem>>, %arg4: memref<128x128xbf16, #tpu.memory_space<vmem>>, %arg5: memref<16x16xf32, #tpu.memory_space<vmem>>, %arg6: memref<1x128xf32, #tpu.memory_space<vmem>>, %arg7: memref<1x128xf32, #tpu.memory_space<vmem>>, %arg8: memref<128x384xbf16, #tpu.memory_space<vmem>>, %arg9: memref<128x128xbf16, #tpu.memory_space<vmem>>, %arg10: memref<1x128xf32, #tpu.memory_space<vmem>>, %arg11: memref<1x128xf32, #tpu.memory_space<vmem>>, %arg12: memref<128x1024xbf16, #tpu.memory_space<vmem>>, %arg13: memref<512x128xbf16, #tpu.memory_space<vmem>>, %arg14: memref<16x128xf32, #tpu.memory_space<vmem>>) attributes {dimension_semantics = [#tpu.dimension_semantics<parallel>], iteration_bounds = array<i64: 2>, scalar_prefetch = 0 : i64, scratch_operands = 0 : i64, tpu.core_type = #tpu.core_type<tc>, window_params = [{transform_indices = @transform_0, window_bounds = array<i64: 16, 128>}, {pipeline_mode = #tpu.pipeline_mode<synchronous>, transform_indices = @transform_1, window_bounds = array<i64: 16, 128>}, {pipeline_mode = #tpu.pipeline_mode<synchronous>, transform_indices = @transform_2, window_bounds = array<i64: 16, 128>}, {pipeline_mode = #tpu.pipeline_mode<synchronous>, transform_indices = @transform_3, window_bounds = array<i64: 128, 128>}, {pipeline_mode = #tpu.pipeline_mode<synchronous>, transform_indices = @transform_4, window_bounds = array<i64: 16, 16>}, {pipeline_mode = #tpu.pipeline_mode<synchronous>, transform_indices = @transform_5, window_bounds = array<i64: 1, 128>}, {pipeline_mode = #tpu.pipeline_mode<synchronous>, transform_indices = @transform_6, window_bounds = array<i64: 1, 128>}, {pipeline_mode = #tpu.pipeline_mode<synchronous>, transform_indices = @transform_7, window_bounds = array<i64: 128, 384>}, {pipeline_mode = #tpu.pipeline_mode<synchronous>, transform_indices = @transform_8, window_bounds = array<i64: 128, 128>}, {pipeline_mode = #tpu.pipeline_mode<synchronous>, transform_indices = @transform_9, window_bounds = array<i64: 1, 128>}, {pipeline_mode = #tpu.pipeline_mode<synchronous>, transform_indices = @transform_10, window_bounds = array<i64: 1, 128>}, {pipeline_mode = #tpu.pipeline_mode<synchronous>, transform_indices = @transform_11, window_bounds = array<i64: 128, 1024>}, {pipeline_mode = #tpu.pipeline_mode<synchronous>, transform_indices = @transform_12, window_bounds = array<i64: 512, 128>}, {transform_indices = @transform_13, window_bounds = array<i64: 16, 128>}]} {
    %c0 = arith.constant 0 : index
    %c0_0 = arith.constant 0 : index
    %0 = vector.load %arg1[%c0, %c0_0] : memref<16x128xf32, #tpu.memory_space<vmem>>, vector<16x128xf32>
    %c0_1 = arith.constant 0 : index
    %c0_2 = arith.constant 0 : index
    %1 = vector.load %arg6[%c0_1, %c0_2] : memref<1x128xf32, #tpu.memory_space<vmem>>, vector<1x128xf32>
    %c0_3 = arith.constant 0 : index
    %c0_4 = arith.constant 0 : index
    %2 = vector.load %arg7[%c0_3, %c0_4] : memref<1x128xf32, #tpu.memory_space<vmem>>, vector<1x128xf32>
    %cst = arith.constant dense<0.000000e+00> : vector<16xf32>
    %3 = vector.multi_reduction <add>, %0, %cst [1] : vector<16x128xf32> to vector<16xf32>
    %4 = vector.shape_cast %3 : vector<16xf32> to vector<16x1xf32>
    %cst_5 = arith.constant 1.280000e+02 : f32
    %5 = vector.broadcast %cst_5 : f32 to vector<16x1xf32>
    %6 = arith.divf %4, %5 : vector<16x1xf32>
    %7 = vector.broadcast %6 : vector<16x1xf32> to vector<16x128xf32>
    %8 = arith.subf %0, %7 : vector<16x128xf32>
    %9 = arith.mulf %8, %8 : vector<16x128xf32>
    %cst_6 = arith.constant dense<0.000000e+00> : vector<16xf32>
    %10 = vector.multi_reduction <add>, %9, %cst_6 [1] : vector<16x128xf32> to vector<16xf32>
    %11 = vector.shape_cast %10 : vector<16xf32> to vector<16x1xf32>
    %cst_7 = arith.constant 1.280000e+02 : f32
    %12 = vector.broadcast %cst_7 : f32 to vector<16x1xf32>
    %13 = arith.divf %11, %12 : vector<16x1xf32>
    %14 = vector.broadcast %6 : vector<16x1xf32> to vector<16x128xf32>
    %15 = arith.subf %0, %14 : vector<16x128xf32>
    %cst_8 = arith.constant 9.99999974E-6 : f32
    %16 = vector.broadcast %cst_8 : f32 to vector<16x1xf32>
    %17 = arith.addf %13, %16 : vector<16x1xf32>
    %18 = math.rsqrt %17 : vector<16x1xf32>
    %19 = vector.broadcast %18 : vector<16x1xf32> to vector<16x128xf32>
    %20 = arith.mulf %15, %19 : vector<16x128xf32>
    %21 = vector.broadcast %1 : vector<1x128xf32> to vector<16x128xf32>
    %22 = arith.mulf %20, %21 : vector<16x128xf32>
    %23 = vector.broadcast %2 : vector<1x128xf32> to vector<16x128xf32>
    %24 = arith.addf %22, %23 : vector<16x128xf32>
    %c0_9 = arith.constant 0 : index
    %c0_10 = arith.constant 0 : index
    %25 = vector.load %arg8[%c0_9, %c0_10] : memref<128x384xbf16, #tpu.memory_space<vmem>>, vector<128x384xbf16>
    %26 = arith.truncf %24 : vector<16x128xf32> to vector<16x128xbf16>
    %cst_11 = arith.constant dense<0.000000e+00> : vector<16x384xf32>
    %27 = tpu.matmul %26, %25, %cst_11 {dimension_numbers = #tpu.dot_dimension_numbers<[1], [0], [0], [1], [0, 0, 1, 1], [], []>} : vector<16x128xbf16>, vector<128x384xbf16>, vector<16x384xf32> -> vector<16x384xf32>
    %28 = vector.extract_strided_slice %27 {offsets = [0, 0], sizes = [16, 128], strides = [1, 1]} : vector<16x384xf32> to vector<16x128xf32>
    %29 = vector.extract_strided_slice %27 {offsets = [0, 128], sizes = [16, 128], strides = [1, 1]} : vector<16x384xf32> to vector<16x128xf32>
    %30 = vector.extract_strided_slice %27 {offsets = [0, 256], sizes = [16, 128], strides = [1, 1]} : vector<16x384xf32> to vector<16x128xf32>
    %c0_12 = arith.constant 0 : index
    %c0_13 = arith.constant 0 : index
    %31 = vector.load %arg2[%c0_12, %c0_13] : memref<16x128xf32, #tpu.memory_space<vmem>>, vector<16x128xf32>
    %c0_14 = arith.constant 0 : index
    %c0_15 = arith.constant 0 : index
    %32 = vector.load %arg3[%c0_14, %c0_15] : memref<16x128xf32, #tpu.memory_space<vmem>>, vector<16x128xf32>
    %c0_16 = arith.constant 0 : index
    %c0_17 = arith.constant 0 : index
    %33 = vector.load %arg4[%c0_16, %c0_17] : memref<128x128xbf16, #tpu.memory_space<vmem>>, vector<128x128xbf16>
    %34 = arith.mulf %28, %31 : vector<16x128xf32>
    %35 = arith.truncf %28 : vector<16x128xf32> to vector<16x128xbf16>
    %cst_18 = arith.constant dense<0.000000e+00> : vector<16x128xf32>
    %36 = tpu.matmul %35, %33, %cst_18 {dimension_numbers = #tpu.dot_dimension_numbers<[1], [0], [0], [1], [0, 0, 1, 1], [], []>} : vector<16x128xbf16>, vector<128x128xbf16>, vector<16x128xf32> -> vector<16x128xf32>
    %37 = arith.mulf %36, %32 : vector<16x128xf32>
    %38 = arith.addf %34, %37 : vector<16x128xf32>
    %39 = arith.mulf %29, %31 : vector<16x128xf32>
    %40 = arith.truncf %29 : vector<16x128xf32> to vector<16x128xbf16>
    %cst_19 = arith.constant dense<0.000000e+00> : vector<16x128xf32>
    %41 = tpu.matmul %40, %33, %cst_19 {dimension_numbers = #tpu.dot_dimension_numbers<[1], [0], [0], [1], [0, 0, 1, 1], [], []>} : vector<16x128xbf16>, vector<128x128xbf16>, vector<16x128xf32> -> vector<16x128xf32>
    %42 = arith.mulf %41, %32 : vector<16x128xf32>
    %43 = arith.addf %39, %42 : vector<16x128xf32>
    %44 = vector.extract_strided_slice %38 {offsets = [0, 0], sizes = [16, 32], strides = [1, 1]} : vector<16x128xf32> to vector<16x32xf32>
    %45 = vector.extract_strided_slice %38 {offsets = [0, 32], sizes = [16, 32], strides = [1, 1]} : vector<16x128xf32> to vector<16x32xf32>
    %46 = vector.extract_strided_slice %38 {offsets = [0, 64], sizes = [16, 32], strides = [1, 1]} : vector<16x128xf32> to vector<16x32xf32>
    %47 = vector.extract_strided_slice %38 {offsets = [0, 96], sizes = [16, 32], strides = [1, 1]} : vector<16x128xf32> to vector<16x32xf32>
    %48 = vector.shape_cast %44 : vector<16x32xf32> to vector<1x16x32xf32>
    %49 = vector.shape_cast %45 : vector<16x32xf32> to vector<1x16x32xf32>
    %50 = vector.shape_cast %46 : vector<16x32xf32> to vector<1x16x32xf32>
    %51 = vector.shape_cast %47 : vector<16x32xf32> to vector<1x16x32xf32>
    %52 = tpu.concatenate %48, %49, %50, %51 in 0 : vector<1x16x32xf32>, vector<1x16x32xf32>, vector<1x16x32xf32>, vector<1x16x32xf32> -> vector<4x16x32xf32>
    %53 = vector.extract_strided_slice %43 {offsets = [0, 0], sizes = [16, 32], strides = [1, 1]} : vector<16x128xf32> to vector<16x32xf32>
    %54 = vector.extract_strided_slice %43 {offsets = [0, 32], sizes = [16, 32], strides = [1, 1]} : vector<16x128xf32> to vector<16x32xf32>
    %55 = vector.extract_strided_slice %43 {offsets = [0, 64], sizes = [16, 32], strides = [1, 1]} : vector<16x128xf32> to vector<16x32xf32>
    %56 = vector.extract_strided_slice %43 {offsets = [0, 96], sizes = [16, 32], strides = [1, 1]} : vector<16x128xf32> to vector<16x32xf32>
    %57 = vector.shape_cast %53 : vector<16x32xf32> to vector<1x16x32xf32>
    %58 = vector.shape_cast %54 : vector<16x32xf32> to vector<1x16x32xf32>
    %59 = vector.shape_cast %55 : vector<16x32xf32> to vector<1x16x32xf32>
    %60 = vector.shape_cast %56 : vector<16x32xf32> to vector<1x16x32xf32>
    %61 = tpu.concatenate %57, %58, %59, %60 in 0 : vector<1x16x32xf32>, vector<1x16x32xf32>, vector<1x16x32xf32>, vector<1x16x32xf32> -> vector<4x16x32xf32>
    %62 = vector.extract_strided_slice %30 {offsets = [0, 0], sizes = [16, 32], strides = [1, 1]} : vector<16x128xf32> to vector<16x32xf32>
    %63 = vector.extract_strided_slice %30 {offsets = [0, 32], sizes = [16, 32], strides = [1, 1]} : vector<16x128xf32> to vector<16x32xf32>
    %64 = vector.extract_strided_slice %30 {offsets = [0, 64], sizes = [16, 32], strides = [1, 1]} : vector<16x128xf32> to vector<16x32xf32>
    %65 = vector.extract_strided_slice %30 {offsets = [0, 96], sizes = [16, 32], strides = [1, 1]} : vector<16x128xf32> to vector<16x32xf32>
    %66 = vector.shape_cast %62 : vector<16x32xf32> to vector<1x16x32xf32>
    %67 = vector.shape_cast %63 : vector<16x32xf32> to vector<1x16x32xf32>
    %68 = vector.shape_cast %64 : vector<16x32xf32> to vector<1x16x32xf32>
    %69 = vector.shape_cast %65 : vector<16x32xf32> to vector<1x16x32xf32>
    %70 = tpu.concatenate %66, %67, %68, %69 in 0 : vector<1x16x32xf32>, vector<1x16x32xf32>, vector<1x16x32xf32>, vector<1x16x32xf32> -> vector<4x16x32xf32>
    %71 = arith.truncf %52 : vector<4x16x32xf32> to vector<4x16x32xbf16>
    %72 = arith.truncf %61 : vector<4x16x32xf32> to vector<4x16x32xbf16>
    %cst_20 = arith.constant dense<0.000000e+00> : vector<4x16x16xf32>
    %73 = tpu.matmul %71, %72, %cst_20 {dimension_numbers = #tpu.dot_dimension_numbers<[2], [2], [1], [1], [0, 0, 0, 1, 1, 1], [0], [0]>} : vector<4x16x32xbf16>, vector<4x16x32xbf16>, vector<4x16x16xf32> -> vector<4x16x16xf32>
    %cst_21 = arith.constant 0.176776692 : f32
    %74 = vector.broadcast %cst_21 : f32 to vector<4x16x16xf32>
    %75 = arith.mulf %73, %74 : vector<4x16x16xf32>
    %c0_22 = arith.constant 0 : index
    %c0_23 = arith.constant 0 : index
    %76 = vector.load %arg5[%c0_22, %c0_23] : memref<16x16xf32, #tpu.memory_space<vmem>>, vector<16x16xf32>
    %77 = vector.shape_cast %76 : vector<16x16xf32> to vector<1x16x16xf32>
    %78 = vector.broadcast %77 : vector<1x16x16xf32> to vector<4x16x16xf32>
    %79 = arith.addf %75, %78 : vector<4x16x16xf32>
    %cst_24 = arith.constant dense<0xFF800000> : vector<4x16xf32>
    %80 = vector.multi_reduction <maximumf>, %79, %cst_24 [2] : vector<4x16x16xf32> to vector<4x16xf32>
    %81 = vector.shape_cast %80 : vector<4x16xf32> to vector<4x16x1xf32>
    %82 = vector.broadcast %81 : vector<4x16x1xf32> to vector<4x16x16xf32>
    %83 = arith.subf %79, %82 : vector<4x16x16xf32>
    %84 = math.exp %83 : vector<4x16x16xf32>
    %cst_25 = arith.constant dense<0.000000e+00> : vector<4x16xf32>
    %85 = vector.multi_reduction <add>, %84, %cst_25 [2] : vector<4x16x16xf32> to vector<4x16xf32>
    %86 = vector.shape_cast %85 : vector<4x16xf32> to vector<4x16x1xf32>
    %87 = tpu.reciprocal %86 {approx = true} : vector<4x16x1xf32> -> vector<4x16x1xf32>
    %88 = vector.broadcast %87 : vector<4x16x1xf32> to vector<4x16x16xf32>
    %89 = arith.mulf %84, %88 : vector<4x16x16xf32>
    %90 = arith.truncf %89 : vector<4x16x16xf32> to vector<4x16x16xbf16>
    %91 = arith.truncf %70 : vector<4x16x32xf32> to vector<4x16x32xbf16>
    %cst_26 = arith.constant dense<0.000000e+00> : vector<4x16x32xf32>
    %92 = tpu.matmul %90, %91, %cst_26 {dimension_numbers = #tpu.dot_dimension_numbers<[2], [1], [1], [2], [0, 0, 0, 1, 1, 2], [0], [0]>} : vector<4x16x16xbf16>, vector<4x16x32xbf16>, vector<4x16x32xf32> -> vector<4x16x32xf32>
    %93 = vector.extract_strided_slice %92 {offsets = [0, 0, 0], sizes = [1, 16, 32], strides = [1, 1, 1]} : vector<4x16x32xf32> to vector<1x16x32xf32>
    %94 = vector.shape_cast %93 : vector<1x16x32xf32> to vector<16x32xf32>
    %95 = vector.extract_strided_slice %92 {offsets = [1, 0, 0], sizes = [1, 16, 32], strides = [1, 1, 1]} : vector<4x16x32xf32> to vector<1x16x32xf32>
    %96 = vector.shape_cast %95 : vector<1x16x32xf32> to vector<16x32xf32>
    %97 = vector.extract_strided_slice %92 {offsets = [2, 0, 0], sizes = [1, 16, 32], strides = [1, 1, 1]} : vector<4x16x32xf32> to vector<1x16x32xf32>
    %98 = vector.shape_cast %97 : vector<1x16x32xf32> to vector<16x32xf32>
    %99 = vector.extract_strided_slice %92 {offsets = [3, 0, 0], sizes = [1, 16, 32], strides = [1, 1, 1]} : vector<4x16x32xf32> to vector<1x16x32xf32>
    %100 = vector.shape_cast %99 : vector<1x16x32xf32> to vector<16x32xf32>
    %101 = tpu.concatenate %94, %96, %98, %100 in 1 : vector<16x32xf32>, vector<16x32xf32>, vector<16x32xf32>, vector<16x32xf32> -> vector<16x128xf32>
    %c0_27 = arith.constant 0 : index
    %c0_28 = arith.constant 0 : index
    %102 = vector.load %arg9[%c0_27, %c0_28] : memref<128x128xbf16, #tpu.memory_space<vmem>>, vector<128x128xbf16>
    %103 = arith.truncf %101 : vector<16x128xf32> to vector<16x128xbf16>
    %cst_29 = arith.constant dense<0.000000e+00> : vector<16x128xf32>
    %104 = tpu.matmul %103, %102, %cst_29 {dimension_numbers = #tpu.dot_dimension_numbers<[1], [0], [0], [1], [0, 0, 1, 1], [], []>} : vector<16x128xbf16>, vector<128x128xbf16>, vector<16x128xf32> -> vector<16x128xf32>
    %105 = arith.addf %0, %104 : vector<16x128xf32>
    %c0_30 = arith.constant 0 : index
    %c0_31 = arith.constant 0 : index
    %106 = vector.load %arg10[%c0_30, %c0_31] : memref<1x128xf32, #tpu.memory_space<vmem>>, vector<1x128xf32>
    %c0_32 = arith.constant 0 : index
    %c0_33 = arith.constant 0 : index
    %107 = vector.load %arg11[%c0_32, %c0_33] : memref<1x128xf32, #tpu.memory_space<vmem>>, vector<1x128xf32>
    %cst_34 = arith.constant dense<0.000000e+00> : vector<16xf32>
    %108 = vector.multi_reduction <add>, %105, %cst_34 [1] : vector<16x128xf32> to vector<16xf32>
    %109 = vector.shape_cast %108 : vector<16xf32> to vector<16x1xf32>
    %cst_35 = arith.constant 1.280000e+02 : f32
    %110 = vector.broadcast %cst_35 : f32 to vector<16x1xf32>
    %111 = arith.divf %109, %110 : vector<16x1xf32>
    %112 = vector.broadcast %111 : vector<16x1xf32> to vector<16x128xf32>
    %113 = arith.subf %105, %112 : vector<16x128xf32>
    %114 = arith.mulf %113, %113 : vector<16x128xf32>
    %cst_36 = arith.constant dense<0.000000e+00> : vector<16xf32>
    %115 = vector.multi_reduction <add>, %114, %cst_36 [1] : vector<16x128xf32> to vector<16xf32>
    %116 = vector.shape_cast %115 : vector<16xf32> to vector<16x1xf32>
    %cst_37 = arith.constant 1.280000e+02 : f32
    %117 = vector.broadcast %cst_37 : f32 to vector<16x1xf32>
    %118 = arith.divf %116, %117 : vector<16x1xf32>
    %119 = vector.broadcast %111 : vector<16x1xf32> to vector<16x128xf32>
    %120 = arith.subf %105, %119 : vector<16x128xf32>
    %cst_38 = arith.constant 9.99999974E-6 : f32
    %121 = vector.broadcast %cst_38 : f32 to vector<16x1xf32>
    %122 = arith.addf %118, %121 : vector<16x1xf32>
    %123 = math.rsqrt %122 : vector<16x1xf32>
    %124 = vector.broadcast %123 : vector<16x1xf32> to vector<16x128xf32>
    %125 = arith.mulf %120, %124 : vector<16x128xf32>
    %126 = vector.broadcast %106 : vector<1x128xf32> to vector<16x128xf32>
    %127 = arith.mulf %125, %126 : vector<16x128xf32>
    %128 = vector.broadcast %107 : vector<1x128xf32> to vector<16x128xf32>
    %129 = arith.addf %127, %128 : vector<16x128xf32>
    %c0_39 = arith.constant 0 : index
    %c0_40 = arith.constant 0 : index
    %130 = vector.load %arg12[%c0_39, %c0_40] : memref<128x1024xbf16, #tpu.memory_space<vmem>>, vector<128x1024xbf16>
    %131 = arith.truncf %129 : vector<16x128xf32> to vector<16x128xbf16>
    %cst_41 = arith.constant dense<0.000000e+00> : vector<16x1024xf32>
    %132 = tpu.matmul %131, %130, %cst_41 {dimension_numbers = #tpu.dot_dimension_numbers<[1], [0], [0], [1], [0, 0, 1, 1], [], []>} : vector<16x128xbf16>, vector<128x1024xbf16>, vector<16x1024xf32> -> vector<16x1024xf32>
    %133 = vector.extract_strided_slice %132 {offsets = [0, 0], sizes = [16, 512], strides = [1, 1]} : vector<16x1024xf32> to vector<16x512xf32>
    %134 = vector.extract_strided_slice %132 {offsets = [0, 512], sizes = [16, 512], strides = [1, 1]} : vector<16x1024xf32> to vector<16x512xf32>
    %135 = arith.negf %133 : vector<16x512xf32>
    %136 = math.exp %135 : vector<16x512xf32>
    %cst_42 = arith.constant 1.000000e+00 : f32
    %137 = vector.broadcast %cst_42 : f32 to vector<16x512xf32>
    %138 = arith.addf %137, %136 : vector<16x512xf32>
    %139 = arith.divf %137, %138 : vector<16x512xf32>
    %140 = arith.mulf %133, %139 : vector<16x512xf32>
    %141 = arith.mulf %140, %134 : vector<16x512xf32>
    %c0_43 = arith.constant 0 : index
    %c0_44 = arith.constant 0 : index
    %142 = vector.load %arg13[%c0_43, %c0_44] : memref<512x128xbf16, #tpu.memory_space<vmem>>, vector<512x128xbf16>
    %143 = arith.truncf %141 : vector<16x512xf32> to vector<16x512xbf16>
    %cst_45 = arith.constant dense<0.000000e+00> : vector<16x128xf32>
    %144 = tpu.matmul %143, %142, %cst_45 {dimension_numbers = #tpu.dot_dimension_numbers<[1], [0], [0], [1], [0, 0, 1, 1], [], []>} : vector<16x512xbf16>, vector<512x128xbf16>, vector<16x128xf32> -> vector<16x128xf32>
    %145 = arith.addf %105, %144 : vector<16x128xf32>
    %c0_46 = arith.constant 0 : index
    %c0_47 = arith.constant 0 : index
    %146 = vector.load %arg14[%c0_46, %c0_47] : memref<16x128xf32, #tpu.memory_space<vmem>>, vector<16x128xf32>
    tpu.vector_store %arg14[%c0_46, %c0_47], %145 {strides = array<i32>} : memref<16x128xf32, #tpu.memory_space<vmem>>, vector<16x128xf32>,
    return
  }
  func.func @transform_0(%arg0: i32) -> (i32, i32) {
    %c0_i32 = arith.constant 0 : i32
    %c0_i32_0 = arith.constant 0 : i32
    return %arg0, %c0_i32 : i32, i32
  }
  func.func @transform_1(%arg0: i32) -> (i32, i32) {
    %c0_i32 = arith.constant 0 : i32
    %c0_i32_0 = arith.constant 0 : i32
    %c0_i32_1 = arith.constant 0 : i32
    return %c0_i32, %c0_i32_0 : i32, i32
  }
  func.func @transform_2(%arg0: i32) -> (i32, i32) {
    %c0_i32 = arith.constant 0 : i32
    %c0_i32_0 = arith.constant 0 : i32
    %c0_i32_1 = arith.constant 0 : i32
    return %c0_i32, %c0_i32_0 : i32, i32
  }
  func.func @transform_3(%arg0: i32) -> (i32, i32) {
    %c0_i32 = arith.constant 0 : i32
    %c0_i32_0 = arith.constant 0 : i32
    %c0_i32_1 = arith.constant 0 : i32
    return %c0_i32, %c0_i32_0 : i32, i32
  }
  func.func @transform_4(%arg0: i32) -> (i32, i32) {
    %c0_i32 = arith.constant 0 : i32
    %c0_i32_0 = arith.constant 0 : i32
    %c0_i32_1 = arith.constant 0 : i32
    return %c0_i32, %c0_i32_0 : i32, i32
  }
  func.func @transform_5(%arg0: i32) -> (i32, i32) {
    %c0_i32 = arith.constant 0 : i32
    %c0_i32_0 = arith.constant 0 : i32
    %c0_i32_1 = arith.constant 0 : i32
    return %c0_i32, %c0_i32_0 : i32, i32
  }
  func.func @transform_6(%arg0: i32) -> (i32, i32) {
    %c0_i32 = arith.constant 0 : i32
    %c0_i32_0 = arith.constant 0 : i32
    %c0_i32_1 = arith.constant 0 : i32
    return %c0_i32, %c0_i32_0 : i32, i32
  }
  func.func @transform_7(%arg0: i32) -> (i32, i32) {
    %c0_i32 = arith.constant 0 : i32
    %c0_i32_0 = arith.constant 0 : i32
    %c0_i32_1 = arith.constant 0 : i32
    return %c0_i32, %c0_i32_0 : i32, i32
  }
  func.func @transform_8(%arg0: i32) -> (i32, i32) {
    %c0_i32 = arith.constant 0 : i32
    %c0_i32_0 = arith.constant 0 : i32
    %c0_i32_1 = arith.constant 0 : i32
    return %c0_i32, %c0_i32_0 : i32, i32
  }
  func.func @transform_9(%arg0: i32) -> (i32, i32) {
    %c0_i32 = arith.constant 0 : i32
    %c0_i32_0 = arith.constant 0 : i32
    %c0_i32_1 = arith.constant 0 : i32
    return %c0_i32, %c0_i32_0 : i32, i32
  }
  func.func @transform_10(%arg0: i32) -> (i32, i32) {
    %c0_i32 = arith.constant 0 : i32
    %c0_i32_0 = arith.constant 0 : i32
    %c0_i32_1 = arith.constant 0 : i32
    return %c0_i32, %c0_i32_0 : i32, i32
  }
  func.func @transform_11(%arg0: i32) -> (i32, i32) {
    %c0_i32 = arith.constant 0 : i32
    %c0_i32_0 = arith.constant 0 : i32
    %c0_i32_1 = arith.constant 0 : i32
    return %c0_i32, %c0_i32_0 : i32, i32
  }
  func.func @transform_12(%arg0: i32) -> (i32, i32) {
    %c0_i32 = arith.constant 0 : i32
    %c0_i32_0 = arith.constant 0 : i32
    %c0_i32_1 = arith.constant 0 : i32
    return %c0_i32, %c0_i32_0 : i32, i32
  }
  func.func @transform_13(%arg0: i32) -> (i32, i32) {
    %c0_i32 = arith.constant 0 : i32
    %c0_i32_0 = arith.constant 0 : i32
    return %arg0, %c0_i32 : i32, i32
  }
}

</mosaic_0001>

<bundles_post_ra>
// kernel: tile.14
= control target key start
LH: loop header
LB: loop body
LE: loop exit
PB: predicated region body
PF: predicated region fallthrough
CT: control target
= control target key end

     0   :  { %vm68_vm0 = vcmask 1047556   ;;  %s167_s9 = smov 64   ;;  %s168_s10 = smov 32   ;;  %vm70_vm1 = vcmask 261120   ;;  %vm89_vm2 = vcmask 1048320   ;;  %vm110_vm3 = vcmask 785920   ;;  %s259_s0 = inlined_call_operand.vmem [shape: f32[16,4,32], index: 0, kind: input, shape index: {}]   ;;  %s260_s1 = inlined_call_operand.vmem [shape: f32[16,128], index: 1, kind: output, shape index: {}]  }
   0x1   :  { %v152_v0 = vld [vmem:[%s259_s0 + $0x1c] sm:$0xf]  ;;  %v153_v1 = vld [vmem:[%s259_s0 + $0x18] sm:$0xf]  ;;  %v154_v2 = vld [vmem:[%s259_s0 + $0x14] sm:$0xf] }
   0x2   :  { %39 = vst [vmem:[#allocation0 + $0x38] sm:$0xf] %v152_v0  ;;  %v155_v3 = vld [vmem:[%s259_s0 + $0x10] sm:$0xf]  ;;  %v156_v4 = vld [vmem:[%s259_s0 + $0xc] sm:$0xf] }
   0x3   :  { %43 = vst [vmem:[#allocation0 + $0x30] sm:$0xf] %v153_v1  ;;  %v157_v5 = vld [vmem:[%s259_s0 + $0x8] sm:$0xf]  ;;  %v158_v6 = vld [vmem:[%s259_s0 + $0x4] sm:$0xf] }
   0x4   :  { %47 = vst [vmem:[#allocation0 + $0x28] sm:$0xf] %v154_v2  ;;  %v64_v7 = vld [vmem:[%s259_s0] sm:$0xf]  ;;  %v144_v8 = vld [vmem:[%s259_s0 + $0x3c] sm:$0xf] }
   0x5   :  { %51 = vst [vmem:[#allocation0 + $0x20] sm:$0xf] %v155_v3  ;;  %v145_v9 = vld [vmem:[%s259_s0 + $0x38] sm:$0xf]  ;;  %v146_v10 = vld [vmem:[%s259_s0 + $0x34] sm:$0xf] }
   0x6   :  { %55 = vst [vmem:[#allocation0 + $0x18] sm:$0xf] %v156_v4  ;;  %v147_v11 = vld [vmem:[%s259_s0 + $0x30] sm:$0xf]  ;;  %v148_v12 = vld [vmem:[%s259_s0 + $0x2c] sm:$0xf] }
   0x7   :  { %59 = vst [vmem:[#allocation0 + $0x10] sm:$0xf] %v157_v5  ;;  %v149_v13 = vld [vmem:[%s259_s0 + $0x28] sm:$0xf]  ;;  %v150_v15 = vld [vmem:[%s259_s0 + $0x24] sm:$0xf] }
   0x8   :  { %63 = vst [vmem:[#allocation0 + $0x8] sm:$0xf] %v158_v6  ;;  %v151_v17 = vld [vmem:[%s259_s0 + $0x20] sm:$0xf]  ;;  %s166_s0 = smov 96   ;;  %vm131_vm4 = vcmask 523520  }
   0x9   :  { %65 = vst [vmem:[#allocation0] sm:$0xf] %v64_v7 }
   0xa   :  { %7 = vst [vmem:[#allocation0 + $0x78] sm:$0xf] %v144_v8 }
   0xb   :  { %11 = vst [vmem:[#allocation0 + $0x70] sm:$0xf] %v145_v9 }
   0xc   :  { %v84_v14 = vld [vmem:[#allocation0 + $0x3] ss:$8 sm:$0xf0]   ;;  %15 = vst [vmem:[#allocation0 + $0x68] sm:$0xf] %v146_v10 }
   0xd   :  { %v105_v16 = vld [vmem:[#allocation0 + $0x2] ss:$8 sm:$0xf0]   ;;  %19 = vst [vmem:[#allocation0 + $0x60] sm:$0xf] %v147_v11 }
   0xe   :  { %23 = vst [vmem:[#allocation0 + $0x58] sm:$0xf] %v148_v12  ;;  %v126_v18 = vld [vmem:[#allocation0 + $0x1] ss:$8 sm:$0xf0]  }
   0xf   :  { %27 = vst [vmem:[#allocation0 + $0x50] sm:$0xf] %v149_v13  ;;  %v67_v35 = vld [vmem:[#allocation0] ss:$8 sm:$0xf0]  }
  0x10   :  { %v82_v19 = vld [vmem:[#allocation0 + $0x3] ss:$8 sm:$0xf]   ;;  %v103_v20 = vld [vmem:[#allocation0 + $0x2] ss:$8 sm:$0xf]  }
  0x11   :  { %v86_v21 = vsel %vm68_vm0, %v84_v14, %v82_v19  ;;  %v107_v22 = vsel %vm68_vm0, %v105_v16, %v103_v20  ;;  %v124_v23 = vld [vmem:[#allocation0 + $0x1] ss:$8 sm:$0xf]   ;;  %31 = vst [vmem:[#allocation0 + $0x48] sm:$0xf] %v150_v15 }
  0x12   :  { %87 = vrot.lane.b32.xlu0 %v86_v21, %s166_s0  ;;  %108 = vrot.lane.b32.xlu1 %v107_v22, %s167_s9  ;;  %v128_v24 = vsel %vm68_vm0, %v126_v18, %v124_v23  ;;  %35 = vst [vmem:[#allocation0 + $0x40] sm:$0xf] %v151_v17  ;;  %v66_v34 = vld [vmem:[#allocation0] ss:$8 sm:$0xf]  }
  0x13   :  { %129 = vrot.lane.b32.xlu2 %v128_v24, %s168_s10  ;;  %v69_v36 = vsel %vm68_vm0, %v67_v35, %v66_v34 }
  0x14   :  { %v94_v25 = vld [vmem:[#allocation0 + $0x43] ss:$8 sm:$0xf0]   ;;  %v115_v26 = vld [vmem:[#allocation0 + $0x42] ss:$8 sm:$0xf0]  }
  0x15   :  { %v136_v27 = vld [vmem:[#allocation0 + $0x41] ss:$8 sm:$0xf0]   ;;  %71 = vst.msk [vmem:[%s260_s1] sm:$0xff] %vm70_vm1, %v69_v36  }
  0x16   :  { %v75_v38 = vld [vmem:[#allocation0 + $0x40] ss:$8 sm:$0xf0]  }
  0x19   :  { %v92_v28 = vld [vmem:[#allocation0 + $0x43] ss:$8 sm:$0xf]   ;;  %v113_v29 = vld [vmem:[#allocation0 + $0x42] ss:$8 sm:$0xf]  }
  0x1a   :  { %v96_v30 = vsel %vm68_vm0, %v94_v25, %v92_v28  ;;  %v117_v31 = vsel %vm68_vm0, %v115_v26, %v113_v29  ;;  %v134_v32 = vld [vmem:[#allocation0 + $0x41] ss:$8 sm:$0xf]   ;;  %v73_v37 = vld [vmem:[#allocation0 + $0x40] ss:$8 sm:$0xf]  }
  0x1b   :  { %97 = vrot.lane.b32.xlu0 %v96_v30, %s166_s0  ;;  %118 = vrot.lane.b32.xlu1 %v117_v31, %s167_s9  ;;  %v138_v33 = vsel %vm68_vm0, %v136_v27, %v134_v32  ;;  %v77_v40 = vsel %vm68_vm0, %v75_v38, %v73_v37 }
  0x1c   :  { %139 = vrot.lane.b32.xlu2 %v138_v33, %s168_s10  ;;  %159 = vst.msk [vmem:[%s260_s1 + $0x8] sm:$0xff] %vm70_vm1, %v77_v40  }
  0x6d   :  { %v130_v39 = vpop.permute.xlu2 %129  }
  0x76   :  { %v140_v41 = vpop.permute.xlu2 %139  }
  0x84   :  { %v88_v42 = vpop.permute.xlu0 %87   ;;  %v109_v43 = vpop.permute.xlu1 %108  }
  0x85   :  { %90 = vst.msk [vmem:[%s260_s1] sm:$0xff] %vm89_vm2, %v88_v42  }
  0x86   :  { %111 = vst.msk [vmem:[%s260_s1] sm:$0xff] %vm110_vm3, %v109_v43  }
  0x87   :  { %132 = vst.msk [vmem:[%s260_s1] sm:$0xff] %vm131_vm4, %v130_v39  }
  0x8d   :  { %v98_v44 = vpop.permute.xlu0 %97   ;;  %v119_v45 = vpop.permute.xlu1 %118  }
  0x8e   :  { %160 = vst.msk [vmem:[%s260_s1 + $0x8] sm:$0xff] %vm89_vm2, %v98_v44  }
  0x8f   :  { %161 = vst.msk [vmem:[%s260_s1 + $0x8] sm:$0xff] %vm110_vm3, %v119_v45  }
  0x90   :  { %162 = vst.msk [vmem:[%s260_s1 + $0x8] sm:$0xff] %vm131_vm4, %v140_v41  }

// kernel: block_forward.1
= control target key start
LH: loop header
LB: loop body
LE: loop exit
PB: predicated region body
PF: predicated region fallthrough
CT: control target
= control target key end

     0   :  { %s4264_s0 = inlined_call_operand.vmem [shape: f32[32,128], index: 0, kind: input, shape index: {}]   ;;  %s4265_s1 = inlined_call_operand.vmem [shape: f32[16,128], index: 1, kind: input, shape index: {}]   ;;  %s4266_s2 = inlined_call_operand.vmem [shape: f32[16,128], index: 2, kind: input, shape index: {}]   ;;  %s4267_s3 = inlined_call_operand.vmem [shape: bf16[128,128], index: 3, kind: input, shape index: {}]   ;;  %s4268_s4 = inlined_call_operand.vmem [shape: f32[16,16], index: 4, kind: input, shape index: {}]   ;;  %s4269_s5 = inlined_call_operand.vmem [shape: f32[1,128], index: 5, kind: input, shape index: {}]   ;;  %s4270_s6 = inlined_call_operand.vmem [shape: f32[1,128], index: 6, kind: input, shape index: {}]   ;;  %s4271_s7 = inlined_call_operand.hbm [shape: bf16[128,384], index: 7, kind: input, shape index: {}]   ;;  %s4272_s8 = inlined_call_operand.vmem [shape: bf16[128,128], index: 8, kind: input, shape index: {}]   ;;  %s4273_s9 = inlined_call_operand.vmem [shape: f32[1,128], index: 9, kind: input, shape index: {}]   ;;  %s4274_s10 = inlined_call_operand.vmem [shape: f32[1,128], index: 10, kind: input, shape index: {}]   ;;  %s4275_s11 = inlined_call_operand.hbm [shape: bf16[128,1024], index: 11, kind: input, shape index: {}]   ;;  %s4276_s12 = inlined_call_operand.vmem [shape: bf16[512,128], index: 12, kind: input, shape index: {}]   ;;  %s4277_s13 = inlined_call_operand.hbm [shape: f32[32,128], index: 13, kind: output, shape index: {}]  }
   0x1   :  { %4282 = sst [smem:[#allocation15_spill]] %s4271_s7 }
   0x2   :  { %18 = vsyncpa [#allocation3], 0 }
   0x3   :  { %19 = vsyncpa [#allocation6], 0 }
   0x4   :  { %20 = vsyncpa [#allocation4], 0 }
   0x5   :  { %22 = vsyncpa [#allocation4 + $0x1], 0  ;;  %s3670_s25 = smov 0   ;;  %s3672_s26 = smov 0  }
   0x6   :  { %s3674_s27 = smov 0   ;;  %s3676_s28 = smov 0  }
   0x7 LB: > { %4283 = sst [smem:[#allocation11_spill]] %s3582_s27  ;;  %s3691_s29 = sadd.s32 4294967295, %s3586_s28   ;;  %s3586_s28 = sphi %s3676_s28, %s4308_s28   ;;  %s3582_s27 = sphi %s3674_s27, %s4310_s27   ;;  %s3578_s26 = sphi %s3672_s26, %s4312_s26   ;;  %s3574_s25 = sphi %s3670_s25, %s4311_s25  }
   0x8   : > { %s2533_s30 = sadd.s32 4294967294, %s3586_s28   ;;  %s3695_s14 = sadd.s32 1, %s3586_s28  }
   0x9   : > { %4284 = sst [smem:[#allocation12_spill]] %s3695_s14  ;;  %s313_s15 = sadd.s32 1, %s3582_s27 }
   0xa   : > { %s310_s16 = ssub.s32 %s3586_s28, %s3695_s14  ;;  %p323_p0 = scmp.ne.s32.totalorder %s3582_s27, %s3578_s26 }
   0xb   : > { %p311_p1 = scmp.eq.s32.totalorder %s310_s16, 0  ;;  %p324_p2 = scmp.eq.s32.totalorder %s3691_s29, 1 }
   0xc   : > { %p329_p3 = scmp.ne.s32.totalorder %s3578_s26, %s3574_s25  ;;  %p330_p4 = scmp.eq.s32.totalorder %s2533_s30, 1 }
   0xd   : > { %s3706_s17 = scalar_select %p311_p1, %s3582_s27, %s313_s15  }
   0xe   : > { %p3708_p5 = por %p324_p2, %p323_p0  ;;  %p3712_p6 = por %p330_p4, %p329_p3 }
   0xf   : > { %4285 = sst [smem:[#allocation13_spill]] %s3706_s17  ;;  %p2534_p7 = scmp.ge.s32.totalorder %s3586_s28, 1 }
  0x10   : > { %s4287_s19 = scalar_select %p3712_p6, 1, 0 }
  0x11   : > { %p337_p8 = scmp.lt.s32.totalorder %s3586_s28, 3  ;;  %p3267_p9 = scmp.eq.s32.totalorder %s3691_s29, 0 }
  0x12   : > { %4288 = sst [smem:[#allocation14_spill]] %s4287_s19  ;;  %s3588_s24 = smov [#allocation2]  }
  0x13   : > { %p3719_p10 = pnand %p2534_p7, %p337_p8  ;;  %s4290_s7 = sld [smem:[#allocation15_spill]] }
  0x14   : > { %s368_s30 = sshll.u32 %s3588_s24, 4  ;;  %s389_s17 = sshll.u32 %s4275_s11, 4  ;;  %s369_s30 = int_to_ptr.vmem [resolvable:$true] %s368_s30  ;;  %s390_s17 = int_to_ptr.hbm [resolvable:$true] %s389_s17 }
  0x15   : > { %p3256_p11 = pneg %p3719_p10  ;;  %s3589_s27 = smov 192  }
  0x16   : > { %s3590_s14 = smov 12   ;;  %s3591_s19 = smov [#allocation5]  }
  0x17   : > { %p3257_p12 = pnand %p3267_p9, %p3256_p11  ;;  %s391_s21 = sshll.u32 %s3591_s19, 4  ;;  %s392_s21 = int_to_ptr.vmem [resolvable:$true] %s391_s21 }
  0x18   : > { %s3592_s22 = smov 512   ;;  %419 = sbr.rel (%p3719_p10) target bundleno = 2123 (0x84b), region = 72 }
  0x19   : > { %s366_s23 = sshll.u32 %s4290_s7, 4  ;;  %s3593_s7 = smov 32   ;;  %s367_s23 = int_to_ptr.hbm [resolvable:$true] %s366_s23 }
  0x1a   : > { %3259 = dma.hbm_to_vmem [thread:$0]  (!%p3257_p12), %s367_s23, 3072, %s369_s30, [#allocation3], %s3589_s27, %s3589_s27, %s3590_s14  }
  0x1b   : > { %3262 = dma.hbm_to_vmem [thread:$0]  (!%p3257_p12), %s390_s17, 8192, %s392_s21, [#allocation6], %s3592_s22, %s3592_s22, %s3593_s7  }
  0x1d   : > { %3561 = dma.done.wait (%p3267_p9), [#allocation3], 3072  }
  0x1e   : > { %3563 = vsyncadd (%p3267_p9), [#allocation3], 4294964224 }
  0x1f   : > { %3565 = dma.done.wait (%p3267_p9), [#allocation6], 8192  }
  0x20   : > { %3567 = vsyncadd (%p3267_p9), [#allocation6], 4294959104  ;;  %s2542_s27 = sshll.u32 %s3691_s29, 1  ;;  %v3594_v2 = vmov 128.0   ;;  %v2630_v17 = vld [vmem:[#allocation2 + $0xa8] sm:$0xf] }
  0x21   : > { %p470_p13 = scmp.lt.s32.totalorder %s2542_s27, 3  ;;  %3380 = vrcp.f32 %v3594_v2  ;;  %v3131_v18 = vld [vmem:[#allocation2 + $0xb0] sm:$0xf0]  ;;  %v3130_v19 = vld [vmem:[#allocation2 + $0xac] sm:$0xf]  ;;  %s3595_s15 = smov 32  }
  0x22   : > { %v2631_v20 = vor.u32 %v3131_v18, %v2630_v17  ;;  %v2632_v21 = vld [vmem:[#allocation2 + $0xb4] sm:$0xf0]  ;;  %v2638_v22 = vld [vmem:[#allocation2 + $0xb0] sm:$0xf]  ;;  %v3132_v23 = vld [vmem:[#allocation2 + $0xb8] sm:$0xf0] }
  0x23   : > { %s4314_s27 = smov (!%p470_p13, %s2542_s27), 3  ;;  %v2635_v24 = vor.u32 %v3130_v19, %v2632_v21  ;;  %v2639_v25 = vor.u32 %v3132_v23, %v2638_v22  ;;  %v2618_v26 = vld [vmem:[#allocation2 + $0x90] sm:$0xf]  ;;  %v3128_v27 = vld [vmem:[#allocation2 + $0x98] sm:$0xf0]  ;;  %s3596_s16 = smov 64  }
  0x24   : > { %s2543_s7 = sshll.u32 %s4314_s27, 3  ;;  %699 = vmatpush.bf16.msra.mxu0 %v2631_v20  ;;  %v3127_v28 = vld [vmem:[#allocation2 + $0x94] sm:$0xf]  ;;  %v2619_v29 = vor.u32 %v3128_v27, %v2618_v26  ;;  %v2620_v30 = vld [vmem:[#allocation2 + $0x9c] sm:$0xf0]  ;;  %s3597_s21 = smov 96  }
  0x25   : > { %s3747_s19 = scalar_lea.vmem %s4264_s0, %s2543_s7  ;;  %713 = vmatpush.bf16.msra.mxu1 %v2635_v24  ;;  %727 = vmatpush.bf16.msra.mxu2 %v2639_v25  ;;  %v2626_v31 = vld [vmem:[#allocation2 + $0x98] sm:$0xf]  ;;  %v3129_v32 = vld [vmem:[#allocation2 + $0xa0] sm:$0xf0]  ;;  %v2623_v33 = vor.u32 %v3127_v28, %v2620_v30  ;;  %v3124_v37 = vld [vmem:[#allocation2 + $0x7c] sm:$0xf] }
  0x26   : > { %v477_v0 = vld [vmem:[%s3747_s19] sm:$0xff]  ;;  %v478_v1 = vld [vmem:[%s3747_s19 + $0x8] sm:$0xff]  ;;  %v2627_v34 = vor.u32 %v3129_v32, %v2626_v31  ;;  %v2606_v35 = vld [vmem:[#allocation2 + $0x78] sm:$0xf]  ;;  %vm937_vm7 = vcmask 261120   ;;  %vm1066_vm8 = vcmask 130048  }
  0x27   : > { %481 = vadd.xlane.f32.xlu0 %v477_v0  ;;  %v3381_v3 = vpop.eup %3380  ;;  %v3125_v36 = vld [vmem:[#allocation2 + $0x80] sm:$0xf0]  ;;  %v2608_v39 = vld [vmem:[#allocation2 + $0x84] sm:$0xf0]  ;;  %v2614_v40 = vld [vmem:[#allocation2 + $0x80] sm:$0xf] }
  0x28   : > { %v486_v4 = vmul.f32 128.0, %v3381_v3  ;;  %vm490_vm0 = vweird.f32 %v3381_v3  ;;  %700 = vmatpush.bf16.msra.mxu0 %v2619_v29  ;;  %v2607_v38 = vor.u32 %v3125_v36, %v2606_v35  ;;  %v3126_v41 = vld [vmem:[#allocation2 + $0x88] sm:$0xf0]  ;;  %v2611_v42 = vor.u32 %v3124_v37, %v2608_v39  ;;  %v2594_v44 = vld [vmem:[#allocation2 + $0x60] sm:$0xf]  ;;  %v3140_v32 = vld [vmem:[%s4267_s3 + $0x38] sm:$0xff] }
  0x29   : > { %714 = vmatpush.bf16.msra.mxu1 %v2623_v33  ;;  %728 = vmatpush.bf16.msra.mxu2 %v2627_v34  ;;  %v2615_v43 = vor.u32 %v3126_v41, %v2614_v40  ;;  %v3122_v45 = vld [vmem:[#allocation2 + $0x68] sm:$0xf0]  ;;  %v3121_v46 = vld [vmem:[#allocation2 + $0x64] sm:$0xf]  ;;  %v2596_v48 = vld [vmem:[#allocation2 + $0x6c] sm:$0xf0] }
  0x2a   : > { %v487_v5 = vsub.f32 1.0, %v486_v4  ;;  %v2595_v47 = vor.u32 %v3122_v45, %v2594_v44  ;;  %v2602_v49 = vld [vmem:[#allocation2 + $0x68] sm:$0xf]  ;;  %v3123_v50 = vld [vmem:[#allocation2 + $0x70] sm:$0xf0]  ;;  %v2599_v51 = vor.u32 %v3121_v46, %v2596_v48  ;;  %812 = vmatpush.bf16.msra.mxu3 %v3140_v32  ;;  %vm1309_vm9 = vcmask 523264  }
  0x2b   : > { %v2603_v52 = vor.u32 %v3123_v50, %v2602_v49  ;;  %v2582_v53 = vld [vmem:[#allocation2 + $0x48] sm:$0xf]  ;;  %v3119_v54 = vld [vmem:[#allocation2 + $0x50] sm:$0xf0]  ;;  %v3118_v55 = vld [vmem:[#allocation2 + $0x4c] sm:$0xf] }
  0x2c   : > { %v488_v6 = vmul.f32 %v3381_v3, %v487_v5  ;;  %701 = vmatpush.bf16.msra.mxu0 %v2607_v38  ;;  %v2583_v56 = vor.u32 %v3119_v54, %v2582_v53  ;;  %v2584_v57 = vld [vmem:[#allocation2 + $0x54] sm:$0xf0]  ;;  %v2590_v58 = vld [vmem:[#allocation2 + $0x50] sm:$0xf]  ;;  %v3120_v59 = vld [vmem:[#allocation2 + $0x58] sm:$0xf0] }
  0x2d   : > { %715 = vmatpush.bf16.msra.mxu1 %v2611_v42  ;;  %729 = vmatpush.bf16.msra.mxu2 %v2615_v43  ;;  %v2587_v60 = vor.u32 %v3118_v55, %v2584_v57  ;;  %v2591_v61 = vor.u32 %v3120_v59, %v2590_v58  ;;  %v2570_v62 = vld [vmem:[#allocation2 + $0x30] sm:$0xf]  ;;  %v3116_v63 = vld [vmem:[#allocation2 + $0x38] sm:$0xf0]  ;;  %v2572_v2 = vld [vmem:[#allocation2 + $0x3c] sm:$0xf0] }
  0x2e   : > { %v489_v7 = vadd.f32 %v3381_v3, %v488_v6  ;;  %v3117_v4 = vld [vmem:[#allocation2 + $0x40] sm:$0xf0]  ;;  %v2546_v19 = vld [vmem:[#allocation2] sm:$0xf]  ;;  %v3110_v20 = vld [vmem:[#allocation2 + $0x8] sm:$0xf0] }
  0x2f   : > { %483 = vadd.xlane.f32.xlu0 %v478_v1  ;;  %v3109_v21 = vld [vmem:[#allocation2 + $0x4] sm:$0xf]  ;;  %v2547_v23 = vor.u32 %v3110_v20, %v2546_v19  ;;  %v2548_v24 = vld [vmem:[#allocation2 + $0xc] sm:$0xf0]  ;;  %v2554_v25 = vld [vmem:[#allocation2 + $0x8] sm:$0xf] }
  0x30   : > { %v3751_v8 = vsel %vm490_vm0, %v3381_v3, %v489_v7  ;;  %702 = vmatpush.bf16.msra.mxu0 %v2595_v47  ;;  %v2578_v3 = vld [vmem:[#allocation2 + $0x38] sm:$0xf]  ;;  %v3111_v26 = vld [vmem:[#allocation2 + $0x10] sm:$0xf0]  ;;  %v2551_v28 = vor.u32 %v3109_v21, %v2548_v24  ;;  %v3138_v39 = vld [vmem:[%s4267_s3 + $0x28] sm:$0xff]  ;;  %vm1312_vm10 = vcmask 785408  }
  0x31   : > { %716 = vmatpush.bf16.msra.mxu1 %v2599_v51  ;;  %730 = vmatpush.bf16.msra.mxu2 %v2603_v52  ;;  %v2579_v6 = vor.u32 %v3117_v4, %v2578_v3  ;;  %v2558_v7 = vld [vmem:[#allocation2 + $0x18] sm:$0xf]  ;;  %v2555_v29 = vor.u32 %v3111_v26, %v2554_v25  ;;  %v3139_v34 = vld [vmem:[%s4267_s3 + $0x30] sm:$0xff]  ;;  %v3137_v42 = vld [vmem:[%s4267_s3 + $0x20] sm:$0xff]  ;;  %s466_s27 = sand.u32 1, %s3578_s26   ;;  %s3245_s14 = sshll.u32 %s3691_s29, 4 }
  0x32   : > { %813 = vmatpush.bf16.msra.mxu3 %v3139_v34  ;;  %v3136_v47 = vld [vmem:[%s4267_s3 + $0x18] sm:$0xff]  ;;  %v3376_v52 = vld [vmem:[%s4269_s5] ss:$0 sm:$0xff]  ;;  %v742_v20 = vld [vmem:[%s4265_s1 + $0x8] sm:$0xff]  ;;  %s2541_s7 = sshll.u32 %s466_s27, 4  ;;  %s2434_s29 = scalar_lea.sflag [#allocation4], %s466_s27 }
  0x33   : > { %v3377_v57 = vld [vmem:[%s4270_s6] ss:$0 sm:$0xff] }
  0x34   : > { %703 = vmatpush.bf16.msra.mxu0 %v2583_v56 }
  0x35   : > { %717 = vmatpush.bf16.msra.mxu1 %v2587_v60  ;;  %731 = vmatpush.bf16.msra.mxu2 %v2591_v61 }
  0x36   : > { %814 = vmatpush.bf16.msra.mxu3 %v3138_v39 }
  0x39   : > { %732 = vmatpush.bf16.msra.mxu2 %v2579_v6 }
  0x3a   : > { %815 = vmatpush.bf16.msra.mxu3 %v3137_v42 }
  0x3e   : > { %816 = vmatpush.bf16.msra.mxu3 %v3136_v47 }
  0x9a   : > { %v482_v9 = vpop.xlane.xlu0 %481 }
  0x9b   : > { %v492_v10 = vmul.f32 %v3751_v8, %v482_v9  ;;  %v3113_v9 = vld [vmem:[#allocation2 + $0x20] sm:$0xf0] }
  0x9d   : > { %v3754_v11 = vsub.f32 %v477_v0, %v492_v10  ;;  %v3115_v0 = vld [vmem:[#allocation2 + $0x34] sm:$0xf]  ;;  %v3112_v10 = vld [vmem:[#allocation2 + $0x1c] sm:$0xf] }
  0x9e   : > { %v2575_v5 = vor.u32 %v3115_v0, %v2572_v2 }
  0x9f   : > { %v496_v12 = vmul.f32 %v3754_v11, %v3754_v11 }
  0xa0   : > { %718 = vmatpush.bf16.msra.mxu1 %v2575_v5 }
  0xa1   : > { %498 = vadd.xlane.f32.xlu1 %v496_v12  ;;  %v2559_v12 = vor.u32 %v3113_v9, %v2558_v7 }
  0xa2   : > { %v484_v13 = vpop.xlane.xlu0 %483 }
  0xa3   : > { %v493_v14 = vmul.f32 %v3751_v8, %v484_v13  ;;  %v2560_v13 = vld [vmem:[#allocation2 + $0x24] sm:$0xf0] }
  0xa4   : > { %v2563_v17 = vor.u32 %v3112_v10, %v2560_v13 }
  0xa5   : > { %v3759_v15 = vsub.f32 %v478_v1, %v493_v14  ;;  %v2571_v1 = vor.u32 %v3116_v63, %v2570_v62  ;;  %v2566_v14 = vld [vmem:[#allocation2 + $0x20] sm:$0xf] }
  0xa6   : > { %719 = vmatpush.bf16.msra.mxu1 %v2563_v17  ;;  %v3133_v62 = vld [vmem:[%s4267_s3] sm:$0xff] }
  0xa7   : > { %v497_v16 = vmul.f32 %v3759_v15, %v3759_v15  ;;  %704 = vmatpush.bf16.msra.mxu0 %v2571_v1  ;;  %v741_v17 = vld [vmem:[%s4265_s1] sm:$0xff] }
  0xa9   : > { %500 = vadd.xlane.f32.xlu1 %v497_v16  ;;  %v3114_v16 = vld [vmem:[#allocation2 + $0x28] sm:$0xf0] }
  0xaa   : > { %v2567_v18 = vor.u32 %v3114_v16, %v2566_v14  ;;  %720 = vmatpush.bf16.msra.mxu1 %v2551_v28  ;;  %v743_v14 = vld [vmem:[%s4266_s2] sm:$0xff] }
  0xab   : > { %705 = vmatpush.bf16.msra.mxu0 %v2559_v12 }
  0xac   : > { %733 = vmatpush.bf16.msra.mxu2 %v2567_v18 }
  0xaf   : > { %706 = vmatpush.bf16.msra.mxu0 %v2547_v23 }
  0xb0   : > { %734 = vmatpush.bf16.msra.mxu2 %v2555_v29 }
  0xb3   : > { %833 = vmatpush.bf16.msrb.mxu0 %v3140_v32 }
  0xb7   : > { %834 = vmatpush.bf16.msrb.mxu0 %v3139_v34 }
  0xbb   : > { %835 = vmatpush.bf16.msrb.mxu0 %v3138_v39 }
  0xbf   : > { %836 = vmatpush.bf16.msrb.mxu0 %v3137_v42 }
  0xc3   : > { %837 = vmatpush.bf16.msrb.mxu0 %v3136_v47 }
 0x114   : > { %v499_v22 = vpop.xlane.xlu1 %498 }
 0x115   : > { %v502_v27 = vmul.f32 %v499_v22, %v3751_v8  ;;  %v744_v22 = vld [vmem:[%s4266_s2 + $0x8] sm:$0xff] }
 0x117   : > { %v504_v30 = vadd.f32 1e-05, %v502_v27 }
 0x119   : > { %3382 = vrsqrt.f32 %v504_v30  ;;  %vm512_vm2 = vweird.f32 %v504_v30 }
 0x11c   : > { %v501_v31 = vpop.xlane.xlu1 %500 }
 0x11d   : > { %v503_v33 = vmul.f32 %v501_v31, %v3751_v8 }
 0x11f   : > { %v3383_v35 = vpop.eup %3382  ;;  %v505_v36 = vadd.f32 1e-05, %v503_v33 }
 0x120   : > { %v507_v37 = vmul.f32 %v3383_v35, %v504_v30  ;;  %vm513_vm1 = vweird.f32 %v3383_v35 }
 0x121   : > { %3384 = vrsqrt.f32 %v505_v36  ;;  %vm514_vm3 = vmor %vm512_vm2, %vm513_vm1  ;;  %vm522_vm5 = vweird.f32 %v505_v36 }
 0x122   : > { %v508_v38 = vmul.f32 %v3383_v35, %v507_v37 }
 0x124   : > { %v509_v40 = vmul.f32 0.5, %v508_v38 }
 0x126   : > { %v510_v41 = vsub.f32 1.5, %v509_v40 }
 0x127   : > { %v3385_v43 = vpop.eup %3384 }
 0x128   : > { %v511_v44 = vmul.f32 %v3383_v35, %v510_v41  ;;  %v517_v45 = vmul.f32 %v3385_v43, %v505_v36  ;;  %vm523_vm4 = vweird.f32 %v3385_v43 }
 0x129   : > { %vm524_vm6 = vmor %vm522_vm5, %vm523_vm4 }
 0x12a   : > { %v518_v46 = vmul.f32 %v3385_v43, %v517_v45  ;;  %v515_v48 = vsel %vm514_vm3, %v3383_v35, %v511_v44 }
 0x12b   : > { %v526_v51 = vmul.f32 %v515_v48, %v3754_v11  ;;  %v3135_v11 = vld [vmem:[%s4267_s3 + $0x10] sm:$0xff] }
 0x12c   : > { %v519_v49 = vmul.f32 0.5, %v518_v46  ;;  %817 = vmatpush.bf16.msra.mxu3 %v3135_v11  ;;  %838 = vmatpush.bf16.msrb.mxu0 %v3135_v11 }
 0x12d   : > { %v531_v56 = vmul.f32 %v3376_v52, %v526_v51 }
 0x12e   : > { %v520_v50 = vsub.f32 1.5, %v519_v49 }
 0x12f   : > { %v536_v59 = vadd.f32 %v3377_v57, %v531_v56 }
 0x130   : > { %v521_v53 = vmul.f32 %v3385_v43, %v520_v50 }
 0x132   : > { %v525_v54 = vsel %vm524_vm6, %v3385_v43, %v521_v53 }
 0x133   : > { %v527_v55 = vmul.f32 %v525_v54, %v3759_v15  ;;  %v3134_v15 = vld [vmem:[%s4267_s3 + $0x8] sm:$0xff] }
 0x134   : > { %818 = vmatpush.bf16.msra.mxu3 %v3134_v15  ;;  %839 = vmatpush.bf16.msrb.mxu0 %v3134_v15 }
 0x135   : > { %v532_v58 = vmul.f32 %v3376_v52, %v527_v55 }
 0x137   : > { %v537_v60 = vadd.f32 %v3377_v57, %v532_v58 }
 0x138   : > { %819 = vmatpush.bf16.msra.mxu3 %v3133_v62  ;;  %840 = vmatpush.bf16.msrb.mxu0 %v3133_v62 }
 0x139   : > { %v570_v61 = vpack.c.bf16 %v537_v60, %v536_v59 }
 0x13b   : > { %707 = vmatmul.bf16.vlgmr.msra.gmra.mxu0 %v570_v61  ;;  %721 = vmatmul.bf16.vlgmr.msra.gmra.mxu1 %v570_v61 }
 0x13c   : > { %735 = vmatmul.bf16.vlgmr.msra.gmra.mxu2 %v570_v61 }
 0x1b8   : > { %v708_v63 = vpop.f32.mrf.mxu0  ;;  %v722_v0 = vpop.f32.mrf.mxu1 }
 0x1b9   : > { %v830_v19 = vmul.f32 %v741_v17, %v722_v0  ;;  %v761_v30 = vmul.f32 %v741_v17, %v708_v63 }
 0x1bf   : > { %v3797_v1 = vpop.f32.mrf.mxu2 }
 0x1c0   : > { %v710_v2 = vpop.f32.mrf.mxu0  ;;  %v724_v3 = vpop.f32.mrf.mxu1  ;;  %v1163_v6 = vpack.c.bf16 %v3797_v1, %v3797_v1 }
 0x1c1   : > { %v832_v4 = vpack.c.bf16 %v724_v3, %v722_v0  ;;  %v763_v5 = vpack.c.bf16 %v710_v2, %v708_v63  ;;  %v831_v25 = vmul.f32 %v742_v20, %v724_v3  ;;  %v762_v33 = vmul.f32 %v742_v20, %v710_v2 }
 0x1c2   : > { %v1178_v10 = vunpack.c.l.b16 %v1163_v6 }
 0x1c3   : > { %820 = vmatmul.bf16.vlgmr.msra.gmra.mxu3 %v763_v5  ;;  %841 = vmatmul.bf16.vlgmr.msrb.gmra.mxu0 %v832_v4 }
 0x1c7   : > { %v3801_v7 = vpop.f32.mrf.mxu2 }
 0x1c8   : > { %v1164_v9 = vpack.c.bf16 %v3801_v7, %v3801_v7 }
 0x1ca   : > { %v1179_v12 = vunpack.c.l.b16 %v1164_v9 }
 0x1cc   : > { %v1180_v13 = vpack.c.b16 %v1179_v12, %v1178_v10 }
 0x1ce   : > { %1192 = vmatpush.bf16.msrb.mxu2 %v1180_v13 }
 0x240   : > { %v842_v16 = vpop.f32.mrf.mxu0 }
 0x241   : > { %v847_v18 = vmul.f32 %v842_v16, %v743_v14 }
 0x243   : > { %v849_v23 = vadd.f32 %v847_v18, %v830_v19 }
 0x245   : > { %v919_v29 = vpack.c.bf16 %v849_v23, %v849_v23 }
 0x246   : > { %v821_v21 = vpop.f32.mrf.mxu3 }
 0x247   : > { %v826_v27 = vmul.f32 %v821_v21, %v743_v14  ;;  %v934_v37 = vunpack.c.l.b16 %v919_v29 }
 0x248   : > { %v844_v24 = vpop.f32.mrf.mxu0 }
 0x249   : > { %v848_v26 = vmul.f32 %v844_v24, %v744_v22  ;;  %v828_v35 = vadd.f32 %v826_v27, %v761_v30 }
 0x24b   : > { %v850_v28 = vadd.f32 %v848_v26, %v831_v25  ;;  %v911_v42 = vpack.c.bf16 %v828_v35, %v828_v35 }
 0x24d   : > { %v3331_v31 = vpack.i.bf16 %v850_v28, %v849_v23  ;;  %v920_v32 = vpack.c.bf16 %v850_v28, %v850_v28  ;;  %v929_v46 = vunpack.c.l.b16 %v911_v42 }
 0x24e   : > { %v823_v34 = vpop.f32.mrf.mxu3 }
 0x24f   : > { %v827_v36 = vmul.f32 %v823_v34, %v744_v22  ;;  %3332 = vrot.lane.b32.xlu1 %v3331_v31, %s3595_s15  ;;  %3327 = vrot.lane.b32.xlu0 %v3331_v31, %s3596_s16  ;;  %v935_v38 = vunpack.c.l.b16 %v920_v32 }
 0x250   : > { %3317 = vrot.lane.b32.xlu2 %v3331_v31, %s3597_s21 }
 0x251   : > { %v829_v39 = vadd.f32 %v827_v36, %v762_v33  ;;  %v936_v40 = vpack.c.b16 %v935_v38, %v934_v37 }
 0x253   : > { %v942_v41 = vsel %vm937_vm7, %v936_v40, 0  ;;  %v912_v43 = vpack.c.bf16 %v829_v39, %v829_v39  ;;  %v3321_v45 = vpack.i.bf16 %v829_v39, %v828_v35 }
 0x254   : > { %951 = vmatpush.bf16.xpose.msrb.mxu1 %v942_v41  ;;  %v1056_v41 = vld [vmem:[%s4268_s4] sm:$0xff] }
 0x255   : > { %v930_v44 = vunpack.c.l.b16 %v912_v43 }
 0x257   : > { %v931_v47 = vpack.c.b16 %v930_v44, %v929_v46 }
 0x258   : > { %3322 = vrot.lane.b32.xlu2 %v3321_v45, %s3597_s21 }
 0x25b   : > { %2672 = vmatmul.msk.bf16.vlgmr.msrb.gmra.mxu1 %vm937_vm7, %v931_v47  ;;  %v1057_v47 = vld [vmem:[%s4268_s4 + $0x8] sm:$0xff] }
 0x260   : > { %3337 = vrot.lane.b32.xlu2 %v3321_v45, %s3596_s16 }
 0x268   : > { %3342 = vrot.lane.b32.xlu2 %v3321_v45, %s3595_s15 }
 0x2aa   : > { %v3318_v48 = vpop.permute.xlu2 %3317 }
 0x2ab   : > { %v3320_v49 = vunpack.i.h.bf16 %v3318_v48  ;;  %v3319_v50 = vunpack.i.l.bf16 %v3318_v48 }
 0x2ad   : > { %v922_v51 = vpack.c.bf16 %v3320_v49, %v3320_v49  ;;  %v921_v52 = vpack.c.bf16 %v3319_v50, %v3319_v50 }
 0x2af   : > { %v966_v53 = vunpack.c.l.b16 %v922_v51  ;;  %v965_v54 = vunpack.c.l.b16 %v921_v52 }
 0x2b1   : > { %v967_v55 = vpack.c.b16 %v966_v53, %v965_v54 }
 0x2b2   : > { %v3323_v56 = vpop.permute.xlu2 %3322 }
 0x2b3   : > { %v3325_v57 = vunpack.i.h.bf16 %v3323_v56  ;;  %v3324_v58 = vunpack.i.l.bf16 %v3323_v56  ;;  %v972_v59 = vsel %vm937_vm7, %v967_v55, 0 }
 0x2b4   : > { %981 = vmatpush.bf16.xpose.msrb.mxu3 %v972_v59 }
 0x2b5   : > { %v914_v60 = vpack.c.bf16 %v3325_v57, %v3325_v57  ;;  %v913_v61 = vpack.c.bf16 %v3324_v58, %v3324_v58 }
 0x2b7   : > { %v961_v11 = vunpack.c.l.b16 %v914_v60  ;;  %v960_v15 = vunpack.c.l.b16 %v913_v61 }
 0x2b9   : > { %v962_v62 = vpack.c.b16 %v961_v11, %v960_v15 }
 0x2ba   : > { %v3338_v63 = vpop.permute.xlu2 %3337 }
 0x2bb   : > { %2673 = vmatmul.msk.bf16.vlgmr.msrb.gmra.mxu3 %vm937_vm7, %v962_v62  ;;  %v3340_v10 = vunpack.i.h.bf16 %v3338_v63  ;;  %v3339_v12 = vunpack.i.l.bf16 %v3338_v63 }
 0x2bd   : > { %v916_v24 = vpack.c.bf16 %v3340_v10, %v3340_v10  ;;  %v915_v25 = vpack.c.bf16 %v3339_v12, %v3339_v12 }
 0x2bf   : > { %v991_v32 = vunpack.c.l.b16 %v916_v24  ;;  %v990_v33 = vunpack.c.l.b16 %v915_v25 }
 0x2c1   : > { %v3333_v0 = vpop.permute.xlu1 %3332  ;;  %v3328_v2 = vpop.permute.xlu0 %3327  ;;  %v992_v36 = vpack.c.b16 %v991_v32, %v990_v33 }
 0x2c2   : > { %v3335_v3 = vunpack.i.h.bf16 %v3333_v0  ;;  %v3334_v4 = vunpack.i.l.bf16 %v3333_v0  ;;  %v3330_v5 = vunpack.i.h.bf16 %v3328_v2  ;;  %v3329_v6 = vunpack.i.l.bf16 %v3328_v2  ;;  %v3343_v9 = vpop.permute.xlu2 %3342 }
 0x2c3   : > { %v3345_v13 = vunpack.i.h.bf16 %v3343_v9  ;;  %v3344_v14 = vunpack.i.l.bf16 %v3343_v9  ;;  %v3847_v9 = vpack.i.bf16 %v3801_v7, %v3797_v1 }
 0x2c4   : > { %v926_v16 = vpack.c.bf16 %v3335_v3, %v3335_v3  ;;  %v925_v17 = vpack.c.bf16 %v3334_v4, %v3334_v4  ;;  %v924_v18 = vpack.c.bf16 %v3330_v5, %v3330_v5  ;;  %v923_v19 = vpack.c.bf16 %v3329_v6, %v3329_v6 }
 0x2c5   : > { %v918_v28 = vpack.c.bf16 %v3345_v13, %v3345_v13  ;;  %v917_v29 = vpack.c.bf16 %v3344_v14, %v3344_v14 }
 0x2c6   : > { %v1026_v20 = vunpack.c.l.b16 %v926_v16  ;;  %v1025_v21 = vunpack.c.l.b16 %v925_v17  ;;  %v996_v22 = vunpack.c.l.b16 %v924_v18  ;;  %v995_v23 = vunpack.c.l.b16 %v923_v19 }
 0x2c7   : > { %v1021_v34 = vunpack.c.l.b16 %v918_v28  ;;  %v1020_v35 = vunpack.c.l.b16 %v917_v29 }
 0x2c8   : > { %v1027_v26 = vpack.c.b16 %v1026_v20, %v1025_v21  ;;  %v997_v27 = vpack.c.b16 %v996_v22, %v995_v23 }
 0x2c9   : > { %v1022_v37 = vpack.c.b16 %v1021_v34, %v1020_v35 }
 0x2ca   : > { %v1002_v30 = vsel %vm937_vm7, %v997_v27, 0  ;;  %v1032_v31 = vsel %vm937_vm7, %v1027_v26, 0 }
 0x2cb   : > { %1011 = vmatpush.bf16.xpose.msra.mxu3 %v1002_v30  ;;  %1041 = vmatpush.bf16.xpose.msra.mxu1 %v1032_v31 }
 0x2d2   : > { %2674 = vmatmul.msk.bf16.vlgmr.msra.gmra.mxu3 %vm937_vm7, %v992_v36  ;;  %2675 = vmatmul.msk.bf16.vlgmr.msra.gmra.mxu1 %vm937_vm7, %v1022_v37 }
 0x2d8   : > { %v953_v38 = vpop.f32.mrf.mxu1 }
 0x2d9   : > { %v1048_v61 = vmul.f32 0.17677669, %v953_v38 }
 0x2db   : > { %v1058_v3 = vadd.f32 %v1056_v41, %v1048_v61 }
 0x2dd   : > { %v1067_v5 = vsel %vm1066_vm8, %v1058_v3, -inf }
 0x2e0   : > { %v955_v45 = vpop.f32.mrf.mxu1 }
 0x2e1   : > { %v1049_v53 = vmul.f32 0.17677669, %v955_v45 }
 0x2e3   : > { %v1059_v60 = vadd.f32 %v1057_v47, %v1049_v53 }
 0x2e5   : > { %v1070_v62 = vsel %vm1066_vm8, %v1059_v60, -inf }
 0x33e   : > { %v983_v39 = vpop.f32.mrf.mxu3 }
 0x33f   : > { %v1050_v40 = vmul.f32 0.17677669, %v983_v39 }
 0x341   : > { %v1060_v42 = vadd.f32 %v1056_v41, %v1050_v40 }
 0x343   : > { %v1073_v43 = vsel %vm1066_vm8, %v1060_v42, -inf }
 0x344   : > { %1074 = vmax.xlane.f32.xlu2 %v1073_v43 }
 0x346   : > { %v985_v44 = vpop.f32.mrf.mxu3 }
 0x347   : > { %v1051_v46 = vmul.f32 0.17677669, %v985_v44 }
 0x349   : > { %v1061_v48 = vadd.f32 %v1057_v47, %v1051_v46 }
 0x34b   : > { %v1076_v49 = vsel %vm1066_vm8, %v1061_v48, -inf }
 0x34c   : > { %1077 = vmax.xlane.f32.xlu0 %v1076_v49 }
 0x34f   : > { %v1043_v50 = vpop.f32.mrf.mxu1 }
 0x350   : > { %v1054_v51 = vmul.f32 0.17677669, %v1043_v50 }
 0x352   : > { %v1064_v52 = vadd.f32 %v1056_v41, %v1054_v51 }
 0x354   : > { %v1085_v54 = vsel %vm1066_vm8, %v1064_v52, -inf }
 0x355   : > { %v1013_v55 = vpop.f32.mrf.mxu3  ;;  %1086 = vmax.xlane.f32.xlu0 %v1085_v54 }
 0x356   : > { %v1052_v56 = vmul.f32 0.17677669, %v1013_v55 }
 0x357   : > { %v1045_v57 = vpop.f32.mrf.mxu1 }
 0x358   : > { %v1055_v58 = vmul.f32 0.17677669, %v1045_v57  ;;  %v1062_v59 = vadd.f32 %v1056_v41, %v1052_v56 }
 0x35a   : > { %v1079_v11 = vsel %vm1066_vm8, %v1062_v59, -inf  ;;  %v1065_v15 = vadd.f32 %v1057_v47, %v1055_v58 }
 0x35b   : > { %1080 = vmax.xlane.f32.xlu1 %v1079_v11 }
 0x35c   : > { %v1088_v63 = vsel %vm1066_vm8, %v1065_v15, -inf }
 0x35d   : > { %v1015_v0 = vpop.f32.mrf.mxu3  ;;  %1071 = vmax.xlane.f32.xlu0 %v1070_v62  ;;  %1089 = vmax.xlane.f32.xlu2 %v1088_v63 }
 0x35e   : > { %v1053_v2 = vmul.f32 0.17677669, %v1015_v0 }
 0x360   : > { %v1063_v4 = vadd.f32 %v1057_v47, %v1053_v2 }
 0x362   : > { %v1082_v6 = vsel %vm1066_vm8, %v1063_v4, -inf }
 0x363   : > { %1068 = vmax.xlane.f32.xlu1 %v1067_v5 }
 0x365   : > { %1083 = vmax.xlane.f32.xlu2 %v1082_v6 }
 0x371   : > { %3347 = vrot.lane.b32.xlu0 %v3847_v9, %s3597_s21 }
 0x379   : > { %3357 = vrot.lane.b32.xlu0 %v3847_v9, %s3595_s15 }
 0x3b7   : > { %v1075_v14 = vpop.xlane.xlu2 %1074 }
 0x3b8   : > { %v1093_v19 = vsub.f32 %v1060_v42, %v1075_v14 }
 0x3ba   : > { %v1103_v7 = vmul.f32 1.442695, %v1093_v19 }
 0x3bf   : > { %v1078_v10 = vpop.xlane.xlu0 %1077 }
 0x3c0   : > { %v1094_v12 = vsub.f32 %v1061_v48, %v1078_v10 }
 0x3c2   : > { %v1105_v13 = vmul.f32 1.442695, %v1094_v12 }
 0x3c4   : > { %3386 = vpow2.f32 %v1105_v13 }
 0x3c8   : > { %v1087_v16 = vpop.xlane.xlu0 %1086 }
 0x3c9   : > { %v1097_v17 = vsub.f32 %v1064_v52, %v1087_v16 }
 0x3ca   : > { %v3853_v18 = vpop.eup %3386 }
 0x3cb   : > { %v1111_v20 = vmul.f32 1.442695, %v1097_v17  ;;  %v1124_v1 = vsel %vm1066_vm8, %v3853_v18, 0.0 }
 0x3cc   : > { %1125 = vadd.xlane.f32.xlu1 %v1124_v1 }
 0x3cd   : > { %3388 = vpow2.f32 %v1111_v20 }
 0x3ce   : > { %v1081_v21 = vpop.xlane.xlu1 %1080  ;;  %3390 = vpow2.f32 %v1103_v7 }
 0x3cf   : > { %v1095_v26 = vsub.f32 %v1062_v59, %v1081_v21 }
 0x3d0   : > { %v1072_v22 = vpop.xlane.xlu0 %1071  ;;  %v1090_v23 = vpop.xlane.xlu2 %1089 }
 0x3d1   : > { %v1092_v24 = vsub.f32 %v1059_v60, %v1072_v22  ;;  %v1107_v29 = vmul.f32 1.442695, %v1095_v26  ;;  %v1098_v34 = vsub.f32 %v1065_v15, %v1090_v23 }
 0x3d3   : > { %v3857_v25 = vpop.eup %3388  ;;  %v1101_v27 = vmul.f32 1.442695, %v1092_v24  ;;  %v1113_v38 = vmul.f32 1.442695, %v1098_v34 }
 0x3d4   : > { %v1133_v28 = vsel %vm1066_vm8, %v3857_v25, 0.0  ;;  %v3391_v31 = vpop.eup %3390 }
 0x3d5   : > { %3392 = vpow2.f32 %v1101_v27  ;;  %1134 = vadd.xlane.f32.xlu2 %v1133_v28  ;;  %v1121_v37 = vsel %vm1066_vm8, %v3391_v31, 0.0 }
 0x3d6   : > { %3394 = vpow2.f32 %v1107_v29  ;;  %v1069_v39 = vpop.xlane.xlu1 %1068 }
 0x3d7   : > { %v1091_v42 = vsub.f32 %v1058_v3, %v1069_v39 }
 0x3d8   : > { %v1084_v30 = vpop.xlane.xlu2 %1083 }
 0x3d9   : > { %v1096_v32 = vsub.f32 %v1063_v4, %v1084_v30  ;;  %v1099_v50 = vmul.f32 1.442695, %v1091_v42 }
 0x3db   : > { %v3861_v33 = vpop.eup %3392  ;;  %v1109_v35 = vmul.f32 1.442695, %v1096_v32 }
 0x3dc   : > { %v1118_v36 = vsel %vm1066_vm8, %v3861_v33, 0.0  ;;  %v3395_v40 = vpop.eup %3394 }
 0x3dd   : > { %3396 = vpow2.f32 %v1109_v35  ;;  %1119 = vadd.xlane.f32.xlu0 %v1118_v36  ;;  %1122 = vadd.xlane.f32.xlu2 %v1121_v37  ;;  %v1127_v46 = vsel %vm1066_vm8, %v3395_v40, 0.0 }
 0x3de   : > { %3398 = vpow2.f32 %v1113_v38 }
 0x3df   : > { %3400 = vpow2.f32 %v1099_v50 }
 0x3e3   : > { %v3397_v41 = vpop.eup %3396  ;;  %v3348_v43 = vpop.permute.xlu0 %3347 }
 0x3e4   : > { %v3350_v44 = vunpack.i.h.bf16 %v3348_v43  ;;  %v3349_v45 = vunpack.i.l.bf16 %v3348_v43  ;;  %v1130_v47 = vsel %vm1066_vm8, %v3397_v41, 0.0  ;;  %v3868_v53 = vpop.eup %3398 }
 0x3e5   : > { %1128 = vadd.xlane.f32.xlu2 %v1127_v46  ;;  %1131 = vadd.xlane.f32.xlu1 %v1130_v47  ;;  %v1136_v58 = vsel %vm1066_vm8, %v3868_v53, 0.0  ;;  %v3872_v15 = vpop.eup %3400 }
 0x3e6   : > { %v1166_v48 = vpack.c.bf16 %v3350_v44, %v3350_v44  ;;  %v1165_v49 = vpack.c.bf16 %v3349_v45, %v3349_v45  ;;  %v1115_v63 = vsel %vm1066_vm8, %v3872_v15, 0.0 }
 0x3e8   : > { %v1207_v51 = vunpack.c.l.b16 %v1166_v48  ;;  %v1206_v52 = vunpack.c.l.b16 %v1165_v49 }
 0x3ea   : > { %v1208_v54 = vpack.c.b16 %v1207_v51, %v1206_v52 }
 0x3eb   : > { %v3358_v55 = vpop.permute.xlu0 %3357 }
 0x3ec   : > { %v3360_v56 = vunpack.i.h.bf16 %v3358_v55  ;;  %v3359_v57 = vunpack.i.l.bf16 %v3358_v55  ;;  %1220 = vmatpush.bf16.msrb.mxu3 %v1208_v54 }
 0x3ed   : > { %1137 = vadd.xlane.f32.xlu1 %v1136_v58 }
 0x3ee   : > { %v1170_v59 = vpack.c.bf16 %v3360_v56, %v3360_v56  ;;  %v1169_v60 = vpack.c.bf16 %v3359_v57, %v3359_v57  ;;  %v3147_v57 = vld [vmem:[%s4272_s8 + $0x30] sm:$0xff] }
 0x3f0   : > { %v1263_v61 = vunpack.c.l.b16 %v1170_v59  ;;  %v1262_v11 = vunpack.c.l.b16 %v1169_v60 }
 0x3f2   : > { %v1264_v62 = vpack.c.b16 %v1263_v61, %v1262_v11 }
 0x3f4   : > { %1276 = vmatpush.bf16.msrb.mxu1 %v1264_v62 }
 0x3f5   : > { %1116 = vadd.xlane.f32.xlu1 %v1115_v63 }
 0x3fd   : > { %3352 = vrot.lane.b32.xlu2 %v3847_v9, %s3596_s16 }
 0x43f   : > { %v1126_v2 = vpop.xlane.xlu1 %1125 }
 0x440   : > { %3402 = vrcp.f32 %v1126_v2  ;;  %v3145_v2 = vld [vmem:[%s4272_s8 + $0x20] sm:$0xff] }
 0x446   : > { %v3403_v4 = vpop.eup %3402 }
 0x447   : > { %v1150_v5 = vmul.f32 %v3403_v4, %v3853_v18  ;;  %v3143_v4 = vld [vmem:[%s4272_s8 + $0x10] sm:$0xff] }
 0x448   : > { %v1135_v0 = vpop.xlane.xlu2 %1134 }
 0x449   : > { %v1158_v13 = vpack.c.bf16 %v1150_v5, %v1150_v5  ;;  %v3142_v5 = vld [vmem:[%s4272_s8 + $0x8] sm:$0xff] }
 0x44b   : > { %v1202_v17 = vunpack.c.l.b16 %v1158_v13 }
 0x450   : > { %v1123_v3 = vpop.xlane.xlu2 %1122  ;;  %v1120_v20 = vpop.xlane.xlu0 %1119 }
 0x451   : > { %3404 = vrcp.f32 %v1123_v3  ;;  %v3144_v3 = vld [vmem:[%s4272_s8 + $0x18] sm:$0xff] }
 0x457   : > { %v3405_v6 = vpop.eup %3404 }
 0x458   : > { %v1132_v10 = vpop.xlane.xlu1 %1131  ;;  %v1129_v12 = vpop.xlane.xlu2 %1128  ;;  %v1149_v14 = vmul.f32 %v3405_v6, %v3391_v31  ;;  %v3141_v6 = vld [vmem:[%s4272_s8] sm:$0xff] }
 0x459   : > { %3406 = vrcp.f32 %v1132_v10 }
 0x45a   : > { %3408 = vrcp.f32 %v1129_v12  ;;  %v1157_v16 = vpack.c.bf16 %v1149_v14, %v1149_v14 }
 0x45b   : > { %3410 = vrcp.f32 %v1135_v0  ;;  %v3146_v0 = vld [vmem:[%s4272_s8 + $0x28] sm:$0xff] }
 0x45c   : > { %v1201_v19 = vunpack.c.l.b16 %v1157_v16 }
 0x45e   : > { %v1203_v1 = vpack.c.b16 %v1202_v17, %v1201_v19 }
 0x45f   : > { %v3407_v9 = vpop.eup %3406 }
 0x460   : > { %v3409_v7 = vpop.eup %3408  ;;  %v1152_v21 = vmul.f32 %v3407_v9, %v3397_v41  ;;  %v1138_v22 = vpop.xlane.xlu1 %1137  ;;  %2677 = vmatmul.msk.bf16.vlgmr.msrb.gmra.mxu3 %vm1066_vm8, %v1203_v1 }
 0x461   : > { %v3353_v23 = vpop.permute.xlu2 %3352  ;;  %v3411_v24 = vpop.eup %3410  ;;  %v1151_v18 = vmul.f32 %v3409_v7, %v3395_v40  ;;  %3412 = vrcp.f32 %v1138_v22 }
 0x462   : > { %v3355_v26 = vunpack.i.h.bf16 %v3353_v23  ;;  %v3354_v27 = vunpack.i.l.bf16 %v3353_v23  ;;  %v1160_v28 = vpack.c.bf16 %v1152_v21, %v1152_v21  ;;  %3414 = vrcp.f32 %v1120_v20 }
 0x463   : > { %v1159_v29 = vpack.c.bf16 %v1151_v18, %v1151_v18  ;;  %v1153_v32 = vmul.f32 %v3411_v24, %v3857_v25 }
 0x464   : > { %v1168_v30 = vpack.c.bf16 %v3355_v26, %v3355_v26  ;;  %v1167_v31 = vpack.c.bf16 %v3354_v27, %v3354_v27  ;;  %v1230_v36 = vunpack.c.l.b16 %v1160_v28 }
 0x465   : > { %v1229_v37 = vunpack.c.l.b16 %v1159_v29  ;;  %v1161_v41 = vpack.c.bf16 %v1153_v32, %v1153_v32  ;;  %v3454_v29 = vld [vmem:[%s3747_s19] sm:$0xff]  ;;  %v3455_v32 = vld [vmem:[%s3747_s19 + $0x8] sm:$0xff] }
 0x466   : > { %v1235_v34 = vunpack.c.l.b16 %v1168_v30  ;;  %v1234_v35 = vunpack.c.l.b16 %v1167_v31 }
 0x467   : > { %v3413_v38 = vpop.eup %3412  ;;  %v1231_v44 = vpack.c.b16 %v1230_v36, %v1229_v37  ;;  %v1257_v46 = vunpack.c.l.b16 %v1161_v41  ;;  %v3209_v36 = vld [vmem:[#allocation5 + $0x1dc] sm:$0xf0]  ;;  %v3205_v37 = vld [vmem:[#allocation5 + $0x1c4] sm:$0xf]  ;;  %v2946_v41 = vld [vmem:[#allocation5 + $0x1c8] sm:$0xf] }
 0x468   : > { %v1236_v39 = vpack.c.b16 %v1235_v34, %v1234_v35  ;;  %v1154_v40 = vmul.f32 %v3413_v38, %v3868_v53  ;;  %v1117_v42 = vpop.xlane.xlu1 %1116  ;;  %v3415_v43 = vpop.eup %3414  ;;  %v2938_v35 = vld [vmem:[#allocation5 + $0x1c0] sm:$0xf] }
 0x469   : > { %3416 = vrcp.f32 %v1117_v42  ;;  %v1148_v47 = vmul.f32 %v3415_v43, %v3861_v33  ;;  %v3148_v33 = vld [vmem:[%s4272_s8 + $0x38] sm:$0xff]  ;;  %v2939_v38 = vor.u32 %v3209_v36, %v2938_v35  ;;  %v2818_v35 = vld [vmem:[#allocation5 + $0xc8] sm:$0xf] }
 0x46a   : > { %1248 = vmatpush.bf16.msra.mxu0 %v1236_v39  ;;  %v1162_v45 = vpack.c.bf16 %v1154_v40, %v1154_v40  ;;  %1380 = vmatpush.bf16.msra.mxu2 %v3148_v33  ;;  %v2940_v39 = vld [vmem:[#allocation5 + $0x1e0] sm:$0xf0]  ;;  %v3210_v40 = vld [vmem:[#allocation5 + $0x1e4] sm:$0xf0]  ;;  %v2916_v33 = vld [vmem:[#allocation5 + $0x1a8] sm:$0xf0] }
 0x46b   : > { %v1156_v50 = vpack.c.bf16 %v1148_v47, %v1148_v47  ;;  %v2943_v42 = vor.u32 %v3205_v37, %v2940_v39  ;;  %v2947_v43 = vor.u32 %v3210_v40, %v2946_v41  ;;  %1833 = vmatpush.bf16.msra.mxu3 %v2939_v38  ;;  %v3178_v36 = vld [vmem:[#allocation5 + $0xe4] sm:$0xf0]  ;;  %v3174_v39 = vld [vmem:[#allocation5 + $0xcc] sm:$0xf] }
 0x46c   : > { %v1258_v48 = vunpack.c.l.b16 %v1162_v45  ;;  %v2948_v45 = vld [vmem:[#allocation5 + $0x1e8] sm:$0xf0]  ;;  %v2819_v38 = vor.u32 %v3178_v36, %v2818_v35  ;;  %v2924_v35 = vld [vmem:[#allocation5 + $0x1b0] sm:$0xf0]  ;;  %v2930_v36 = vld [vmem:[#allocation5 + $0x198] sm:$0xf] }
 0x46d   : > { %2678 = vmatmul.msk.bf16.vlgmr.msra.gmra.mxu0 %vm1066_vm8, %v1231_v44  ;;  %v1174_v53 = vunpack.c.l.b16 %v1156_v50  ;;  %v3206_v44 = vld [vmem:[#allocation5 + $0x1cc] sm:$0xf]  ;;  %1861 = vmatpush.bf16.msra.mxu1 %v2947_v43  ;;  %v3169_v43 = vld [vmem:[#allocation5 + $0x9c] sm:$0xf0] }
 0x46e   : > { %v1259_v25 = vpack.c.b16 %v1258_v48, %v1257_v46  ;;  %1381 = vmatpush.bf16.msra.mxu2 %v3147_v57  ;;  %v2906_v46 = vld [vmem:[#allocation5 + $0x180] sm:$0xf]  ;;  %v2951_v47 = vor.u32 %v3206_v44, %v2948_v45  ;;  %1847 = vmatpush.bf16.msrb.mxu0 %v2943_v42  ;;  %v2820_v41 = vld [vmem:[#allocation5 + $0xe8] sm:$0xf0]  ;;  %v3165_v44 = vld [vmem:[#allocation5 + $0x84] sm:$0xf] }
 0x46f   : > { %v3417_v49 = vpop.eup %3416  ;;  %v3201_v48 = vld [vmem:[#allocation5 + $0x19c] sm:$0xf0]  ;;  %v2823_v40 = vor.u32 %v3174_v39, %v2820_v41  ;;  %v3200_v39 = vld [vmem:[#allocation5 + $0x19c] sm:$0xf] }
 0x470   : > { %v1147_v51 = vmul.f32 %v3417_v49, %v3872_v15  ;;  %2679 = vmatmul.msk.bf16.vlgmr.msrb.gmra.mxu1 %vm1066_vm8, %v1259_v25  ;;  %v3197_v25 = vld [vmem:[#allocation5 + $0x184] sm:$0xf]  ;;  %v2907_v50 = vor.u32 %v3201_v48, %v2906_v46  ;;  %v2778_v42 = vld [vmem:[#allocation5 + $0x80] sm:$0xf]  ;;  %v3170_v48 = vld [vmem:[#allocation5 + $0xa4] sm:$0xf0] }
 0x471   : > { %v2908_v49 = vld [vmem:[#allocation5 + $0x1a0] sm:$0xf0]  ;;  %v2779_v45 = vor.u32 %v3169_v43, %v2778_v42  ;;  %v2932_v41 = vld [vmem:[#allocation5 + $0x1b8] sm:$0xf0]  ;;  %v2890_v43 = vld [vmem:[#allocation5 + $0x150] sm:$0xf] }
 0x472   : > { %v1155_v52 = vpack.c.bf16 %v1147_v51, %v1147_v51  ;;  %1382 = vmatpush.bf16.msra.mxu2 %v3146_v0  ;;  %v2911_v51 = vor.u32 %v3197_v25, %v2908_v49  ;;  %1834 = vmatpush.bf16.msra.mxu3 %v2907_v50  ;;  %v3193_v0 = vld [vmem:[#allocation5 + $0x15c] sm:$0xf0]  ;;  %v2780_v46 = vld [vmem:[#allocation5 + $0xa0] sm:$0xf0]  ;;  %v3166_v50 = vld [vmem:[#allocation5 + $0x8c] sm:$0xf]  ;;  %v2935_v42 = vor.u32 %v3200_v39, %v2932_v41 }
 0x473   : > { %v2783_v25 = vor.u32 %v3165_v44, %v2780_v46  ;;  %v3195_v44 = vld [vmem:[#allocation5 + $0x16c] sm:$0xf0] }
 0x474   : > { %v1173_v54 = vunpack.c.l.b16 %v1155_v52  ;;  %v2914_v52 = vld [vmem:[#allocation5 + $0x188] sm:$0xf]  ;;  %1848 = vmatpush.bf16.msrb.mxu0 %v2911_v51  ;;  %v2788_v51 = vld [vmem:[#allocation5 + $0xa8] sm:$0xf0]  ;;  %v2891_v46 = vor.u32 %v3195_v44, %v2890_v43  ;;  %v3163_v41 = vld [vmem:[#allocation5 + $0x6c] sm:$0xf0] }
 0x475   : > { %v2770_v43 = vld [vmem:[#allocation5 + $0x58] sm:$0xf] }
 0x476   : > { %v1175_v55 = vpack.c.b16 %v1174_v53, %v1173_v54  ;;  %1383 = vmatpush.bf16.msra.mxu2 %v3145_v2  ;;  %v3202_v53 = vld [vmem:[#allocation5 + $0x1a4] sm:$0xf0]  ;;  %v3198_v54 = vld [vmem:[#allocation5 + $0x18c] sm:$0xf]  ;;  %v3189_v2 = vld [vmem:[#allocation5 + $0x144] sm:$0xf] }
 0x477   : > { %v3164_v44 = vld [vmem:[#allocation5 + $0x74] sm:$0xf0] }
 0x478   : > { %2676 = vmatmul.msk.bf16.vlgmr.msrb.gmra.mxu2 %vm1066_vm8, %v1175_v55  ;;  %v2915_v55 = vor.u32 %v3202_v53, %v2914_v52  ;;  %v2791_v52 = vor.u32 %v3166_v50, %v2788_v51  ;;  %v2746_v53 = vld [vmem:[#allocation5 + $0x40] sm:$0xf]  ;;  %v3192_v51 = vld [vmem:[#allocation5 + $0x15c] sm:$0xf] }
 0x47a   : > { %1384 = vmatpush.bf16.msra.mxu2 %v3144_v3  ;;  %1862 = vmatpush.bf16.msra.mxu1 %v2915_v55  ;;  %v3157_v55 = vld [vmem:[#allocation5 + $0x44] sm:$0xf] }
 0x47e   : > { %1385 = vmatpush.bf16.msra.mxu2 %v3143_v4  ;;  %v2876_v4 = vld [vmem:[#allocation5 + $0x160] sm:$0xf0] }
 0x482   : > { %1386 = vmatpush.bf16.msra.mxu2 %v3142_v5  ;;  %v2882_v5 = vld [vmem:[#allocation5 + $0x148] sm:$0xf] }
 0x486   : > { %1387 = vmatpush.bf16.msra.mxu2 %v3141_v6  ;;  %v3194_v6 = vld [vmem:[#allocation5 + $0x164] sm:$0xf0] }
 0x48a   : > { %1875 = vmatpush.bf16.msrb.mxu2 %v2951_v47  ;;  %v2786_v47 = vld [vmem:[#allocation5 + $0x88] sm:$0xf] }
 0x48b   : > { %v2787_v49 = vor.u32 %v3170_v48, %v2786_v47  ;;  %v2892_v47 = vld [vmem:[#allocation5 + $0x170] sm:$0xf0]  ;;  %v2898_v48 = vld [vmem:[#allocation5 + $0x158] sm:$0xf] }
 0x4e3   : > { %v1222_v56 = vpop.f32.mrf.mxu3 }
 0x4ea   : > { %v1250_v58 = vpop.f32.mrf.mxu0 }
 0x4eb   : > { %v1224_v59 = vpop.f32.mrf.mxu3 }
 0x4ec   : > { %v3361_v60 = vpack.i.bf16 %v1224_v59, %v1222_v56  ;;  %v2919_v56 = vor.u32 %v3198_v54, %v2916_v33  ;;  %v3161_v54 = vld [vmem:[#allocation5 + $0x5c] sm:$0xf0] }
 0x4ed   : > { %v1278_v61 = vpop.f32.mrf.mxu1  ;;  %v2747_v33 = vor.u32 %v3161_v54, %v2746_v53 }
 0x4ee   : > { %3362 = vrot.lane.b32.xlu1 %v3361_v60, %s3595_s15  ;;  %1876 = vmatpush.bf16.msrb.mxu2 %v2919_v56  ;;  %v2748_v56 = vld [vmem:[#allocation5 + $0x60] sm:$0xf0]  ;;  %s468_s15 = scalar_lea.vmem [#allocation7], %s2541_s7  ;;  %s3536_s7 = scalar_lea.hbm %s4277_s13, 32 }
 0x4ef   : > { %s2446_s20 = sshll.u32 %s468_s15, 4  ;;  %s2447_s20 = int_to_ptr.vmem [resolvable:$true] %s2446_s20 }
 0x4f2   : > { %v1252_v11 = vpop.f32.mrf.mxu0 }
 0x4f3   : > { %v3366_v15 = vpack.i.bf16 %v1252_v11, %v1250_v58 }
 0x4f5   : > { %3367 = vrot.lane.b32.xlu2 %v3366_v15, %s3596_s16  ;;  %v1280_v62 = vpop.f32.mrf.mxu1 }
 0x4f6   : > { %v3371_v63 = vpack.i.bf16 %v1280_v62, %v1278_v61 }
 0x4fb   : > { %v1194_v12 = vpop.f32.mrf.mxu2 }
 0x4fd   : > { %3372 = vrot.lane.b32.xlu2 %v3371_v63, %s3597_s21  ;;  %v2874_v63 = vld [vmem:[#allocation5 + $0x140] sm:$0xf]  ;;  %s2445_s21 = scalar_lea.hbm %s4277_s13, %s3245_s14 }
 0x4fe   : > { %v2875_v3 = vor.u32 %v3193_v0, %v2874_v63  ;;  %v2714_v0 = vld [vmem:[#allocation5] sm:$0xf]  ;;  %s2448_s23 = sshll.u32 %s2445_s21, 4  ;;  %s2449_s23 = int_to_ptr.hbm [resolvable:$true] %s2448_s23 }
 0x4ff   : > { %s3530_s24 = sshra.s32 %s2449_s23, 4  ;;  %s3531_s24 = int_to_ptr.hbm [resolvable:$true] %s3530_s24 }
 0x500   : > { %1835 = vmatpush.bf16.msra.mxu3 %v2875_v3  ;;  %v3149_v3 = vld [vmem:[#allocation5 + $0x4] sm:$0xf]  ;;  %s3532_s19 = scalar_lea.hbm %s3531_s24, 16  ;;  %p3537_p3 = scmp.lt.s32.totalorder %s3531_s24, %s4277_s13 }
 0x501   : > { %p3533_p0 = scmp.ne.s32.totalorder %s3531_s24, %s3532_s19  ;;  %p3538_p4 = scmp.lt.s32.totalorder %s3536_s7, %s3532_s19 }
 0x503   : > { %v1196_v19 = vpop.f32.mrf.mxu2  ;;  %p3534_p1 = pnand %p3533_p0, %p3708_p5  ;;  %p3539_p7 = por %p3538_p4, %p3537_p3 }
 0x505   : > { %p3535_p2 = pneg %p3534_p1 }
 0x507   : > { %p3540_p8 = pnand %p3539_p7, %p3535_p2 }
 0x54f   : > { %v3368_v10 = vpop.permute.xlu2 %3367 }
 0x550   : > { %v3370_v9 = vunpack.i.h.bf16 %v3368_v10  ;;  %v3369_v20 = vunpack.i.l.bf16 %v3368_v10  ;;  %v2879_v10 = vor.u32 %v3189_v2, %v2876_v4  ;;  %v3153_v2 = vld [vmem:[#allocation5 + $0x1c] sm:$0xf0] }
 0x551   : > { %v2715_v4 = vor.u32 %v3153_v2, %v2714_v0  ;;  %v3184_v2 = vld [vmem:[#allocation5 + $0x11c] sm:$0xf] }
 0x552   : > { %1849 = vmatpush.bf16.msrb.mxu0 %v2879_v10  ;;  %v3154_v10 = vld [vmem:[#allocation5 + $0x24] sm:$0xf0] }
 0x557   : > { %v3373_v13 = vpop.permute.xlu2 %3372 }
 0x558   : > { %v3375_v1 = vunpack.i.h.bf16 %v3373_v13  ;;  %v3374_v7 = vunpack.i.l.bf16 %v3373_v13  ;;  %v3190_v13 = vld [vmem:[#allocation5 + $0x14c] sm:$0xf] }
 0x560   : > { %v3363_v14 = vpop.permute.xlu1 %3362 }
 0x561   : > { %v3365_v16 = vunpack.i.h.bf16 %v3363_v14  ;;  %v3364_v17 = vunpack.i.l.bf16 %v3363_v14  ;;  %v2884_v14 = vld [vmem:[#allocation5 + $0x168] sm:$0xf0] }
 0x563   : > { %v1308_v21 = vsel %vm937_vm7, %v1196_v19, %v3365_v16  ;;  %v1307_v22 = vsel %vm937_vm7, %v1194_v12, %v3364_v17  ;;  %v2883_v12 = vor.u32 %v3194_v6, %v2882_v5  ;;  %v2887_v16 = vor.u32 %v3190_v13, %v2884_v14  ;;  %v2842_v17 = vld [vmem:[#allocation5 + $0x100] sm:$0xf]  ;;  %v2716_v5 = vld [vmem:[#allocation5 + $0x20] sm:$0xf0]  ;;  %v2722_v6 = vld [vmem:[#allocation5 + $0x8] sm:$0xf] }
 0x564   : > { %v1310_v23 = vsel %vm1309_vm9, %v1307_v22, %v3369_v20  ;;  %v1311_v24 = vsel %vm1309_vm9, %v1308_v21, %v3370_v9  ;;  %v3185_v19 = vld [vmem:[#allocation5 + $0x11c] sm:$0xf0]  ;;  %v3181_v9 = vld [vmem:[#allocation5 + $0x104] sm:$0xf]  ;;  %v3186_v21 = vld [vmem:[#allocation5 + $0x124] sm:$0xf0]  ;;  %v2723_v13 = vor.u32 %v3154_v10, %v2722_v6 }
 0x565   : > { %v1313_v18 = vsel %vm1312_vm10, %v1310_v23, %v3374_v7  ;;  %v1314_v26 = vsel %vm1312_vm10, %v1311_v24, %v3375_v1  ;;  %1863 = vmatpush.bf16.msra.mxu1 %v2883_v12  ;;  %1877 = vmatpush.bf16.msrb.mxu2 %v2887_v16  ;;  %v2843_v20 = vor.u32 %v3185_v19, %v2842_v17  ;;  %v2844_v1 = vld [vmem:[#allocation5 + $0x120] sm:$0xf0]  ;;  %v2850_v7 = vld [vmem:[#allocation5 + $0x108] sm:$0xf]  ;;  %v3182_v24 = vld [vmem:[#allocation5 + $0x10c] sm:$0xf] }
 0x566   : > { %v1331_v27 = vpack.c.bf16 %v1314_v26, %v1313_v18  ;;  %v2847_v22 = vor.u32 %v3181_v9, %v2844_v1  ;;  %v2851_v23 = vor.u32 %v3186_v21, %v2850_v7  ;;  %v2852_v18 = vld [vmem:[#allocation5 + $0x128] sm:$0xf0]  ;;  %v2719_v12 = vor.u32 %v3149_v3, %v2716_v5  ;;  %v2954_v17 = vld [vmem:[#allocation5 + $0x1d0] sm:$0xf]  ;;  %v2956_v1 = vld [vmem:[#allocation5 + $0x1f0] sm:$0xf0] }
 0x567   : > { %1836 = vmatpush.bf16.msra.mxu3 %v2843_v20  ;;  %v2855_v26 = vor.u32 %v3182_v24, %v2852_v18  ;;  %v3150_v14 = vld [vmem:[#allocation5 + $0xc] sm:$0xf]  ;;  %v3211_v9 = vld [vmem:[#allocation5 + $0x1ec] sm:$0xf0]  ;;  %v3207_v20 = vld [vmem:[#allocation5 + $0x1d4] sm:$0xf] }
 0x568   : > { %1388 = vmatmul.bf16.vlgmr.msra.gmra.mxu2 %v1331_v27  ;;  %1850 = vmatpush.bf16.msrb.mxu0 %v2847_v22  ;;  %v2810_v27 = vld [vmem:[#allocation5 + $0xc0] sm:$0xf]  ;;  %v2724_v16 = vld [vmem:[#allocation5 + $0x28] sm:$0xf0]  ;;  %v2955_v7 = vor.u32 %v3211_v9, %v2954_v17  ;;  %v2959_v21 = vor.u32 %v3207_v20, %v2956_v1  ;;  %v2962_v22 = vld [vmem:[#allocation5 + $0x1d8] sm:$0xf] }
 0x569   : > { %1864 = vmatpush.bf16.msra.mxu1 %v2851_v23  ;;  %1878 = vmatpush.bf16.msrb.mxu2 %v2855_v26  ;;  %v2727_v19 = vor.u32 %v3150_v14, %v2724_v16  ;;  %v3212_v23 = vld [vmem:[#allocation5 + $0x1f4] sm:$0xf0]  ;;  %v3208_v24 = vld [vmem:[#allocation5 + $0x1dc] sm:$0xf]  ;;  %v2826_v5 = vld [vmem:[#allocation5 + $0xd0] sm:$0xf] }
 0x56a   : > { %v2963_v18 = vor.u32 %v3212_v23, %v2962_v22  ;;  %v2964_v26 = vld [vmem:[#allocation5 + $0x1f8] sm:$0xf0]  ;;  %v3179_v6 = vld [vmem:[#allocation5 + $0xec] sm:$0xf0]  ;;  %v3175_v10 = vld [vmem:[#allocation5 + $0xd4] sm:$0xf] }
 0x56b   : > { %v2868_v3 = vld [vmem:[#allocation5 + $0x138] sm:$0xf0]  ;;  %v2834_v14 = vld [vmem:[#allocation5 + $0xd8] sm:$0xf]  ;;  %v3171_v23 = vld [vmem:[#allocation5 + $0xac] sm:$0xf0] }
 0x56c   : > { %v3180_v16 = vld [vmem:[#allocation5 + $0xf4] sm:$0xf0]  ;;  %v3176_v20 = vld [vmem:[#allocation5 + $0xdc] sm:$0xf] }
 0x56d   : > { %1865 = vmatpush.bf16.msra.mxu1 %v2819_v38  ;;  %1879 = vmatpush.bf16.msrb.mxu2 %v2823_v40  ;;  %v3204_v38 = vld [vmem:[#allocation5 + $0x1b4] sm:$0xf0]  ;;  %v2835_v9 = vor.u32 %v3180_v16, %v2834_v14  ;;  %v2836_v1 = vld [vmem:[#allocation5 + $0xf8] sm:$0xf0] }
 0x56e   : > { %v2931_v40 = vor.u32 %v3204_v38, %v2930_v36  ;;  %v2839_v22 = vor.u32 %v3176_v20, %v2836_v1  ;;  %v2762_v38 = vld [vmem:[#allocation5 + $0x50] sm:$0xf] }
 0x571   : > { %1866 = vmatpush.bf16.msra.mxu1 %v2787_v49  ;;  %1880 = vmatpush.bf16.msrb.mxu2 %v2791_v52  ;;  %v2900_v52 = vld [vmem:[#allocation5 + $0x178] sm:$0xf0] }
 0x572   : > { %v2903_v54 = vor.u32 %v3192_v51, %v2900_v52  ;;  %v3155_v51 = vld [vmem:[#allocation5 + $0x2c] sm:$0xf0]  ;;  %v3151_v52 = vld [vmem:[#allocation5 + $0x14] sm:$0xf] }
 0x5eb   : > { %v1389_v28 = vpop.f32.mrf.mxu2 }
 0x5ec   : > { %v3917_v30 = vadd.f32 %v3454_v29, %v1389_v28  ;;  %v3177_v28 = vld [vmem:[#allocation5 + $0xdc] sm:$0xf0]  ;;  %v3173_v29 = vld [vmem:[#allocation5 + $0xc4] sm:$0xf] }
 0x5ee   : > { %1398 = vadd.xlane.f32.xlu1 %v3917_v30 }
 0x5f3   : > { %v1391_v31 = vpop.f32.mrf.mxu2 }
 0x5f4   : > { %v3921_v34 = vadd.f32 %v3455_v32, %v1391_v31  ;;  %v2811_v31 = vor.u32 %v3177_v28, %v2810_v27  ;;  %v2812_v32 = vld [vmem:[#allocation5 + $0xe0] sm:$0xf0]  ;;  %v2922_v27 = vld [vmem:[#allocation5 + $0x190] sm:$0xf] }
 0x5f5   : > { %v2815_v37 = vor.u32 %v3173_v29, %v2812_v32  ;;  %v3203_v28 = vld [vmem:[#allocation5 + $0x1ac] sm:$0xf0]  ;;  %v2967_v29 = vor.u32 %v3208_v24, %v2964_v26  ;;  %v3199_v32 = vld [vmem:[#allocation5 + $0x194] sm:$0xf] }
 0x5f6   : > { %1400 = vadd.xlane.f32.xlu2 %v3921_v34  ;;  %1837 = vmatpush.bf16.msra.mxu3 %v2811_v31  ;;  %v2923_v31 = vor.u32 %v3203_v28, %v2922_v27  ;;  %v3167_v24 = vld [vmem:[#allocation5 + $0x94] sm:$0xf]  ;;  %v2802_v28 = vld [vmem:[#allocation5 + $0x98] sm:$0xf] }
 0x5f7   : > { %1851 = vmatpush.bf16.msrb.mxu0 %v2815_v37  ;;  %v2927_v37 = vor.u32 %v3199_v32, %v2924_v35 }
 0x5fa   : > { %1838 = vmatpush.bf16.msra.mxu3 %v2779_v45  ;;  %v3191_v45 = vld [vmem:[#allocation5 + $0x154] sm:$0xf] }
 0x5fb   : > { %1852 = vmatpush.bf16.msrb.mxu0 %v2783_v25  ;;  %v3196_v25 = vld [vmem:[#allocation5 + $0x174] sm:$0xf0]  ;;  %v2895_v49 = vor.u32 %v3191_v45, %v2892_v47 }
 0x5fc   : > { %v2899_v50 = vor.u32 %v3196_v25, %v2898_v48  ;;  %v3160_v48 = vld [vmem:[#allocation5 + $0x5c] sm:$0xf] }
 0x5fd   : > { %v2772_v25 = vld [vmem:[#allocation5 + $0x78] sm:$0xf0] }
 0x5fe   : > { %1839 = vmatpush.bf16.msra.mxu3 %v2747_v33  ;;  %v2858_v33 = vld [vmem:[#allocation5 + $0x110] sm:$0xf] }
 0x602   : > { %1840 = vmatpush.bf16.msra.mxu3 %v2715_v4  ;;  %v2871_v4 = vor.u32 %v3184_v2, %v2868_v3 }
 0x606   : > { %1889 = vmatpush.bf16.msrb.mxu3 %v2955_v7  ;;  %v2794_v7 = vld [vmem:[#allocation5 + $0x90] sm:$0xf] }
 0x607   : > { %v2795_v26 = vor.u32 %v3171_v23, %v2794_v7  ;;  %v3235_v23 = vld [vmem:[%s4276_s12 + $0xb0] sm:$0xff] }
 0x60a   : > { %1890 = vmatpush.bf16.msrb.mxu3 %v2923_v31  ;;  %v3168_v31 = vld [vmem:[#allocation5 + $0x9c] sm:$0xf] }
 0x60e   : > { %1891 = vmatpush.bf16.msrb.mxu3 %v2891_v46  ;;  %v2763_v46 = vor.u32 %v3163_v41, %v2762_v38  ;;  %v3233_v38 = vld [vmem:[%s4276_s12 + $0xa0] sm:$0xff] }
 0x661   : > { %v1399_v57 = vpop.xlane.xlu1 %1398 }
 0x662   : > { %v1402_v58 = vmul.f32 %v1399_v57, %v3751_v8  ;;  %v2754_v57 = vld [vmem:[#allocation5 + $0x48] sm:$0xf] }
 0x664   : > { %v3926_v59 = vsub.f32 %v3917_v30, %v1402_v58  ;;  %v3162_v58 = vld [vmem:[#allocation5 + $0x64] sm:$0xf0] }
 0x666   : > { %v1406_v60 = vmul.f32 %v3926_v59, %v3926_v59 }
 0x668   : > { %1408 = vadd.xlane.f32.xlu0 %v1406_v60  ;;  %v2751_v60 = vor.u32 %v3157_v55, %v2748_v56  ;;  %v3187_v56 = vld [vmem:[#allocation5 + $0x12c] sm:$0xf0] }
 0x669   : > { %v1401_v61 = vpop.xlane.xlu2 %1400 }
 0x66a   : > { %v1403_v11 = vmul.f32 %v1401_v61, %v3751_v8  ;;  %v2755_v61 = vor.u32 %v3162_v58, %v2754_v57  ;;  %1853 = vmatpush.bf16.msrb.mxu0 %v2751_v60  ;;  %v3183_v57 = vld [vmem:[#allocation5 + $0x114] sm:$0xf]  ;;  %v2859_v58 = vor.u32 %v3187_v56, %v2858_v33  ;;  %v2738_v33 = vld [vmem:[#allocation5 + $0x18] sm:$0xf] }
 0x66b   : > { %v2860_v60 = vld [vmem:[#allocation5 + $0x130] sm:$0xf0]  ;;  %v3156_v56 = vld [vmem:[#allocation5 + $0x34] sm:$0xf0] }
 0x66c   : > { %v3932_v15 = vsub.f32 %v3921_v34, %v1403_v11  ;;  %v3158_v11 = vld [vmem:[#allocation5 + $0x4c] sm:$0xf]  ;;  %1867 = vmatpush.bf16.msra.mxu1 %v2755_v61  ;;  %v2866_v61 = vld [vmem:[#allocation5 + $0x118] sm:$0xf]  ;;  %1892 = vmatpush.bf16.msrb.mxu3 %v2859_v58  ;;  %v2740_v58 = vld [vmem:[#allocation5 + $0x38] sm:$0xf0] }
 0x66e   : > { %v1407_v62 = vmul.f32 %v3932_v15, %v3932_v15  ;;  %1854 = vmatpush.bf16.msrb.mxu0 %v2719_v12  ;;  %v2827_v12 = vor.u32 %v3179_v6, %v2826_v5 }
 0x670   : > { %1410 = vadd.xlane.f32.xlu0 %v1407_v62  ;;  %v2756_v62 = vld [vmem:[#allocation5 + $0x68] sm:$0xf0]  ;;  %1868 = vmatpush.bf16.msra.mxu1 %v2723_v13  ;;  %v2828_v13 = vld [vmem:[#allocation5 + $0xf0] sm:$0xf0] }
 0x671   : > { %v2759_v63 = vor.u32 %v3158_v11, %v2756_v62  ;;  %v3188_v11 = vld [vmem:[#allocation5 + $0x134] sm:$0xf0]  ;;  %1893 = vmatpush.bf16.msrb.mxu3 %v2827_v12 }
 0x672   : > { %1903 = vmatpush.bf16.msra.mxu0 %v2959_v21  ;;  %v2867_v0 = vor.u32 %v3188_v11, %v2866_v61 }
 0x673   : > { %1881 = vmatpush.bf16.msrb.mxu2 %v2759_v63  ;;  %v2863_v63 = vor.u32 %v3183_v57, %v2860_v60  ;;  %v3152_v57 = vld [vmem:[#allocation5 + $0x1c] sm:$0xf] }
 0x674   : > { %1917 = vmatpush.bf16.msrb.mxu1 %v2963_v18  ;;  %v2796_v18 = vld [vmem:[#allocation5 + $0xb0] sm:$0xf0] }
 0x675   : > { %v2799_v27 = vor.u32 %v3167_v24, %v2796_v18  ;;  %1894 = vmatpush.bf16.msrb.mxu3 %v2795_v26  ;;  %v3220_v24 = vld [vmem:[%s4276_s12 + $0x38] sm:$0xff]  ;;  %v3226_v26 = vld [vmem:[%s4276_s12 + $0x68] sm:$0xff] }
 0x676   : > { %1904 = vmatpush.bf16.msra.mxu0 %v2927_v37  ;;  %v2804_v37 = vld [vmem:[#allocation5 + $0xb8] sm:$0xf0] }
 0x677   : > { %1882 = vmatpush.bf16.msrb.mxu2 %v2727_v19  ;;  %v2831_v19 = vor.u32 %v3175_v10, %v2828_v13  ;;  %v3378_v13 = vld [vmem:[%s4273_s9] ss:$0 sm:$0xff]  ;;  %v3244_v18 = vld [vmem:[%s4276_s12 + $0xf8] sm:$0xff] }
 0x678   : > { %1918 = vmatpush.bf16.msrb.mxu1 %v2931_v40  ;;  %v3159_v40 = vld [vmem:[#allocation5 + $0x54] sm:$0xf] }
 0x679   : > { %1895 = vmatpush.bf16.msrb.mxu3 %v2763_v46 }
 0x67a   : > { %1905 = vmatpush.bf16.msra.mxu0 %v2895_v49  ;;  %v2730_v49 = vld [vmem:[#allocation5 + $0x10] sm:$0xf] }
 0x67b   : > { %1931 = vmatpush.bf16.msra.mxu2 %v2967_v29  ;;  %v3172_v29 = vld [vmem:[#allocation5 + $0xb4] sm:$0xf0]  ;;  %v2731_v61 = vor.u32 %v3155_v51, %v2730_v49  ;;  %v3217_v49 = vld [vmem:[%s4276_s12 + $0x20] sm:$0xff] }
 0x67c   : > { %1919 = vmatpush.bf16.msrb.mxu1 %v2899_v50  ;;  %v2803_v36 = vor.u32 %v3172_v29, %v2802_v28  ;;  %v2771_v50 = vor.u32 %v3164_v44, %v2770_v43  ;;  %v3224_v43 = vld [vmem:[%s4276_s12 + $0x58] sm:$0xff] }
 0x67d   : > { %1896 = vmatpush.bf16.msrb.mxu3 %v2731_v61  ;;  %v3232_v44 = vld [vmem:[%s4276_s12 + $0x98] sm:$0xff]  ;;  %v3222_v61 = vld [vmem:[%s4276_s12 + $0x48] sm:$0xff] }
 0x67e   : > { %1906 = vmatpush.bf16.msra.mxu0 %v2863_v63 }
 0x67f   : > { %1932 = vmatpush.bf16.msra.mxu2 %v2935_v42  ;;  %v2764_v42 = vld [vmem:[#allocation5 + $0x70] sm:$0xf0] }
 0x680   : > { %1920 = vmatpush.bf16.msrb.mxu1 %v2867_v0  ;;  %v2767_v47 = vor.u32 %v3159_v40, %v2764_v42  ;;  %v2739_v0 = vor.u32 %v3156_v56, %v2738_v33  ;;  %v3231_v33 = vld [vmem:[%s4276_s12 + $0x90] sm:$0xff]  ;;  %v3216_v56 = vld [vmem:[%s4276_s12 + $0x18] sm:$0xff] }
 0x682   : > { %1907 = vmatpush.bf16.msra.mxu0 %v2831_v19 }
 0x683   : > { %1933 = vmatpush.bf16.msra.mxu2 %v2903_v54 }
 0x684   : > { %1921 = vmatpush.bf16.msrb.mxu1 %v2835_v9 }
 0x686   : > { %1908 = vmatpush.bf16.msra.mxu0 %v2799_v27  ;;  %v3234_v27 = vld [vmem:[%s4276_s12 + $0xa8] sm:$0xff] }
 0x687   : > { %1934 = vmatpush.bf16.msra.mxu2 %v2871_v4  ;;  %v2743_v4 = vor.u32 %v3152_v57, %v2740_v58  ;;  %v3240_v57 = vld [vmem:[%s4276_s12 + $0xd8] sm:$0xff] }
 0x688   : > { %1922 = vmatpush.bf16.msrb.mxu1 %v2803_v36 }
 0x68a   : > { %1909 = vmatpush.bf16.msra.mxu0 %v2767_v47 }
 0x68b   : > { %1935 = vmatpush.bf16.msra.mxu2 %v2839_v22  ;;  %v3227_v22 = vld [vmem:[%s4276_s12 + $0x70] sm:$0xff] }
 0x68c   : > { %1923 = vmatpush.bf16.msrb.mxu1 %v2771_v50  ;;  %v3241_v50 = vld [vmem:[%s4276_s12 + $0xe0] sm:$0xff] }
 0x690   : > { %1924 = vmatpush.bf16.msrb.mxu1 %v2739_v0 }
 0x6db   : > { %v1409_v53 = vpop.xlane.xlu0 %1408 }
 0x6dc   : > { %v1412_v55 = vmul.f32 %v1409_v53, %v3751_v8  ;;  %v2732_v53 = vld [vmem:[#allocation5 + $0x30] sm:$0xf0] }
 0x6dd   : > { %v2735_v11 = vor.u32 %v3151_v52, %v2732_v53 }
 0x6de   : > { %v3937_v62 = vadd.f32 1e-05, %v1412_v55  ;;  %v2775_v55 = vor.u32 %v3160_v48, %v2772_v25 }
 0x6df   : > { %1910 = vmatpush.bf16.msra.mxu0 %v2735_v11  ;;  %v3230_v11 = vld [vmem:[%s4276_s12 + $0x88] sm:$0xff] }
 0x6e0   : > { %3418 = vrsqrt.f32 %v3937_v62  ;;  %vm1422_vm12 = vweird.f32 %v3937_v62 }
 0x6e3   : > { %v1411_v17 = vpop.xlane.xlu0 %1410 }
 0x6e4   : > { %v1413_v21 = vmul.f32 %v1411_v17, %v3751_v8  ;;  %v2807_v8 = vor.u32 %v3168_v31, %v2804_v37  ;;  %v3379_v17 = vld [vmem:[%s4274_s10] ss:$0 sm:$0xff] }
 0x6e5   : > { %v3225_v37 = vld [vmem:[%s4276_s12 + $0x60] sm:$0xff] }
 0x6e6   : > { %v3419_v32 = vpop.eup %3418  ;;  %v1415_v35 = vadd.f32 1e-05, %v1413_v21  ;;  %1936 = vmatpush.bf16.msra.mxu2 %v2807_v8  ;;  %v3242_v8 = vld [vmem:[%s4276_s12 + $0xe8] sm:$0xff] }
 0x6e7   : > { %v1417_v39 = vmul.f32 %v3419_v32, %v3937_v62  ;;  %vm1423_vm11 = vweird.f32 %v3419_v32 }
 0x6e8   : > { %3420 = vrsqrt.f32 %v1415_v35  ;;  %vm1424_vm13 = vmor %vm1422_vm12, %vm1423_vm11  ;;  %vm1432_vm15 = vweird.f32 %v1415_v35 }
 0x6e9   : > { %v1418_v45 = vmul.f32 %v3419_v32, %v1417_v39  ;;  %v3218_v39 = vld [vmem:[%s4276_s12 + $0x28] sm:$0xff] }
 0x6ea   : > { %1937 = vmatpush.bf16.msra.mxu2 %v2775_v55  ;;  %v3223_v55 = vld [vmem:[%s4276_s12 + $0x50] sm:$0xff] }
 0x6eb   : > { %v1419_v54 = vmul.f32 0.5, %v1418_v45 }
 0x6ed   : > { %v1420_v60 = vsub.f32 1.5, %v1419_v54 }
 0x6ee   : > { %v3421_v63 = vpop.eup %3420  ;;  %1938 = vmatpush.bf16.msra.mxu2 %v2743_v4  ;;  %v3215_v4 = vld [vmem:[%s4276_s12 + $0x10] sm:$0xff] }
 0x6ef   : > { %v1421_v2 = vmul.f32 %v3419_v32, %v1420_v60  ;;  %v1427_v3 = vmul.f32 %v3421_v63, %v1415_v35  ;;  %vm1433_vm14 = vweird.f32 %v3421_v63  ;;  %v3243_v35 = vld [vmem:[%s4276_s12 + $0xf0] sm:$0xff] }
 0x6f0   : > { %vm1434_vm0 = vmor %vm1432_vm15, %vm1433_vm14 }
 0x6f1   : > { %v1428_v5 = vmul.f32 %v3421_v63, %v1427_v3  ;;  %v1425_v6 = vsel %vm1424_vm13, %v3419_v32, %v1421_v2  ;;  %v3219_v32 = vld [vmem:[%s4276_s12 + $0x30] sm:$0xff] }
 0x6f2   : > { %v1436_v14 = vmul.f32 %v1425_v6, %v3926_v59  ;;  %v3228_v59 = vld [vmem:[%s4276_s12 + $0x78] sm:$0xff] }
 0x6f3   : > { %v1429_v10 = vmul.f32 0.5, %v1428_v5  ;;  %v3239_v5 = vld [vmem:[%s4276_s12 + $0xd0] sm:$0xff] }
 0x6f4   : > { %v1441_v19 = vmul.f32 %v3378_v13, %v1436_v14  ;;  %v3221_v14 = vld [vmem:[%s4276_s12 + $0x40] sm:$0xff] }
 0x6f5   : > { %v1430_v12 = vsub.f32 1.5, %v1429_v10 }
 0x6f6   : > { %v1446_v1 = vadd.f32 %v3379_v17, %v1441_v19 }
 0x6f7   : > { %v1431_v16 = vmul.f32 %v3421_v63, %v1430_v12 }
 0x6f9   : > { %v1435_v62 = vsel %vm1434_vm0, %v3421_v63, %v1431_v16  ;;  %v3229_v16 = vld [vmem:[%s4276_s12 + $0x80] sm:$0xff] }
 0x6fa   : > { %v1437_v9 = vmul.f32 %v1435_v62, %v3932_v15  ;;  %v3236_v15 = vld [vmem:[%s4276_s12 + $0xb8] sm:$0xff] }
 0x6fc   : > { %v1442_v20 = vmul.f32 %v3378_v13, %v1437_v9 }
 0x6fe   : > { %v1447_v7 = vadd.f32 %v3379_v17, %v1442_v20 }
 0x700   : > { %v1512_v21 = vpack.c.bf16 %v1447_v7, %v1446_v1  ;;  %v3214_v1 = vld [vmem:[%s4276_s12 + $0x8] sm:$0xff] }
 0x702   : > { %1841 = vmatmul.bf16.vlgmr.msra.gmra.mxu3 %v1512_v21  ;;  %1855 = vmatmul.bf16.vlgmr.msrb.gmra.mxu0 %v1512_v21 }
 0x703   : > { %1869 = vmatmul.bf16.vlgmr.msra.gmra.mxu1 %v1512_v21  ;;  %1883 = vmatmul.bf16.vlgmr.msrb.gmra.mxu2 %v1512_v21 }
 0x704   : > { %2387 = vmatpush.bf16.msrb.mxu0 %v3228_v59  ;;  %2401 = vmatpush.bf16.msra.mxu1 %v3236_v15  ;;  %v3238_v59 = vld [vmem:[%s4276_s12 + $0xc8] sm:$0xff] }
 0x705   : > { %2373 = vmatpush.bf16.msra.mxu3 %v3220_v24  ;;  %2415 = vmatpush.bf16.msrb.mxu2 %v3244_v18 }
 0x708   : > { %2388 = vmatpush.bf16.msrb.mxu0 %v3227_v22  ;;  %2402 = vmatpush.bf16.msra.mxu1 %v3235_v23 }
 0x709   : > { %2374 = vmatpush.bf16.msra.mxu3 %v3219_v32  ;;  %2416 = vmatpush.bf16.msrb.mxu2 %v3243_v35  ;;  %v3213_v35 = vld [vmem:[%s4276_s12] sm:$0xff] }
 0x70c   : > { %2389 = vmatpush.bf16.msrb.mxu0 %v3226_v26  ;;  %2403 = vmatpush.bf16.msra.mxu1 %v3234_v27 }
 0x70d   : > { %2375 = vmatpush.bf16.msra.mxu3 %v3218_v39  ;;  %2417 = vmatpush.bf16.msrb.mxu2 %v3242_v8 }
 0x710   : > { %2390 = vmatpush.bf16.msrb.mxu0 %v3225_v37  ;;  %2404 = vmatpush.bf16.msra.mxu1 %v3233_v38 }
 0x711   : > { %2376 = vmatpush.bf16.msra.mxu3 %v3217_v49  ;;  %2418 = vmatpush.bf16.msrb.mxu2 %v3241_v50 }
 0x712   : > { %1897 = vmatmul.bf16.vlgmr.msrb.gmra.mxu3 %v1512_v21  ;;  %1911 = vmatmul.bf16.vlgmr.msra.gmra.mxu0 %v1512_v21 }
 0x713   : > { %1925 = vmatmul.bf16.vlgmr.msrb.gmra.mxu1 %v1512_v21  ;;  %1939 = vmatmul.bf16.vlgmr.msra.gmra.mxu2 %v1512_v21 }
 0x714   : > { %2391 = vmatpush.bf16.msrb.mxu0 %v3224_v43  ;;  %2405 = vmatpush.bf16.msra.mxu1 %v3232_v44 }
 0x715   : > { %2377 = vmatpush.bf16.msra.mxu3 %v3216_v56  ;;  %2419 = vmatpush.bf16.msrb.mxu2 %v3240_v57 }
 0x718   : > { %2392 = vmatpush.bf16.msrb.mxu0 %v3223_v55  ;;  %2406 = vmatpush.bf16.msra.mxu1 %v3231_v33 }
 0x719   : > { %2378 = vmatpush.bf16.msra.mxu3 %v3215_v4  ;;  %2420 = vmatpush.bf16.msrb.mxu2 %v3239_v5 }
 0x71c   : > { %2393 = vmatpush.bf16.msrb.mxu0 %v3222_v61  ;;  %2407 = vmatpush.bf16.msra.mxu1 %v3230_v11 }
 0x71d   : > { %2379 = vmatpush.bf16.msra.mxu3 %v3214_v1  ;;  %2421 = vmatpush.bf16.msrb.mxu2 %v3238_v59 }
 0x720   : > { %2394 = vmatpush.bf16.msrb.mxu0 %v3221_v14  ;;  %2408 = vmatpush.bf16.msra.mxu1 %v3229_v16 }
 0x721   : > { %2380 = vmatpush.bf16.msra.mxu3 %v3213_v35 }
 0x77f   : > { %v3975_v28 = vpop.f32.mrf.mxu0 }
 0x780   : > { %v2969_v29 = vmul.f32 -1.442695, %v3975_v28  ;;  %v3978_v31 = vpop.f32.mrf.mxu1 }
 0x781   : > { %v2970_v36 = vmul.f32 -1.442695, %v3978_v31 }
 0x782   : > { %3422 = vpow2.f32 %v2969_v29 }
 0x783   : > { %3424 = vpow2.f32 %v2970_v36  ;;  %v3237_v36 = vld [vmem:[%s4276_s12 + $0xc0] sm:$0xff] }
 0x784   : > { %2422 = vmatpush.bf16.msrb.mxu2 %v3237_v36 }
 0x785   : > { %v3999_v41 = vpop.f32.mrf.mxu3 }
 0x786   : > { %v2968_v40 = vmul.f32 -1.442695, %v3999_v41  ;;  %v4002_v42 = vpop.f32.mrf.mxu2 }
 0x787   : > { %v2971_v45 = vmul.f32 -1.442695, %v4002_v42  ;;  %v4011_v46 = vpop.f32.mrf.mxu0 }
 0x788   : > { %v3423_v47 = vpop.eup %3422  ;;  %3426 = vpow2.f32 %v2968_v40  ;;  %v2973_v48 = vmul.f32 -1.442695, %v4011_v46  ;;  %v4014_v25 = vpop.f32.mrf.mxu1 }
 0x789   : > { %v3425_v51 = vpop.eup %3424  ;;  %v4022_v52 = vadd.f32 1.0, %v3423_v47  ;;  %3428 = vpow2.f32 %v2971_v45  ;;  %v2974_v53 = vmul.f32 -1.442695, %v4014_v25 }
 0x78a   : > { %v4025_v54 = vadd.f32 1.0, %v3425_v51  ;;  %3430 = vpow2.f32 %v2973_v48 }
 0x78b   : > { %3432 = vrcp.f32 %v4022_v52  ;;  %v2001_v24 = vand.u32 2147483647, %v4022_v52  ;;  %v2003_v18 = vand.u32 2147483648, %v4022_v52  ;;  %vm1997_vm1 = vweird.f32 %v4022_v52 }
 0x78c   : > { %3434 = vrcp.f32 %v4025_v54  ;;  %v2016_v27 = vand.u32 2147483647, %v4025_v54  ;;  %v2018_v29 = vand.u32 2147483648, %v4025_v54  ;;  %vm2012_vm4 = vweird.f32 %v4025_v54 }
 0x78d   : > { %3436 = vpow2.f32 %v2974_v53  ;;  %v4041_v58 = vpop.f32.mrf.mxu3  ;;  %vm4113_vm3 = vcmp.eq.f32.partialorder %v2001_v24, 8.507059e+37  ;;  %v2004_v45 = vor.u32 1.1754944e-38, %v2003_v18 }
 0x78e   : > { %v3427_v60 = vpop.eup %3426  ;;  %v2972_v3 = vmul.f32 -1.442695, %v4041_v58  ;;  %v4075_v19 = vpop.f32.mrf.mxu2  ;;  %vm4120_vm6 = vcmp.eq.f32.partialorder %v2016_v27, 8.507059e+37  ;;  %v2019_v48 = vor.u32 1.1754944e-38, %v2018_v29 }
 0x78f   : > { %v3429_v63 = vpop.eup %3428  ;;  %v4049_v0 = vadd.f32 1.0, %v3427_v60  ;;  %v2975_v22 = vmul.f32 -1.442695, %v4075_v19  ;;  %v1912_v11 = vpop.f32.mrf.mxu0 }
 0x790   : > { %v3431_v2 = vpop.eup %3430  ;;  %v4061_v10 = vadd.f32 1.0, %v3429_v63 }
 0x791   : > { %v4058_v6 = vpop.eup %3432  ;;  %3438 = vrcp.f32 %v4049_v0  ;;  %v4077_v20 = vadd.f32 1.0, %v3431_v2  ;;  %v1988_v37 = vand.u32 2147483648, %v4049_v0  ;;  %v1986_v51 = vand.u32 2147483647, %v4049_v0 }
 0x792   : > { %v4063_v12 = vpop.eup %3434  ;;  %v1993_v13 = vmul.f32 %v4058_v6, %v4022_v52  ;;  %3440 = vpow2.f32 %v2972_v3  ;;  %vm1998_vm2 = vweird.f32 %v4058_v6  ;;  %v2031_v55 = vand.u32 2147483647, %v4061_v10 }
 0x793   : > { %v3437_v62 = vpop.eup %3436  ;;  %v2008_v17 = vmul.f32 %v4063_v12, %v4025_v54  ;;  %3442 = vrcp.f32 %v4061_v10  ;;  %vm2013_vm5 = vweird.f32 %v4063_v12  ;;  %vm4126_vm7 = vmor %vm1997_vm1, %vm1998_vm2  ;;  %v4131_v53 = vor.u32 1.1754944e-38, %v1988_v37 }
 0x794   : > { %v1994_v9 = vsub.f32 1.0, %v1993_v13  ;;  %v4083_v21 = vadd.f32 1.0, %v3437_v62  ;;  %3444 = vrcp.f32 %v4077_v20  ;;  %vm4140_vm8 = vmor %vm2012_vm4, %vm2013_vm5  ;;  %vm1982_vm9 = vweird.f32 %v4049_v0  ;;  %v1926_v13 = vpop.f32.mrf.mxu1 }
 0x795   : > { %v2009_v7 = vsub.f32 1.0, %v2008_v17  ;;  %vm2057_vm10 = vweird.f32 %v4077_v20  ;;  %v2061_v54 = vand.u32 2147483647, %v4077_v20  ;;  %vm4165_vm13 = vcmp.eq.f32.partialorder %v1986_v51, 8.507059e+37 }
 0x796   : > { %v1995_v15 = vmul.f32 %v4058_v6, %v1994_v9  ;;  %3446 = vrcp.f32 %v4083_v21  ;;  %v2076_v9 = vand.u32 2147483647, %v4083_v21  ;;  %v2078_v1 = vand.u32 2147483648, %v4083_v21 }
 0x797   : > { %v4091_v23 = vpop.eup %3438  ;;  %v2010_v26 = vmul.f32 %v4063_v12, %v2009_v7  ;;  %3448 = vpow2.f32 %v2975_v22  ;;  %vm2062_vm0 = vcmp.eq.f32.partialorder %v2061_v54, 8.507059e+37  ;;  %vm2072_vm1 = vweird.f32 %v4083_v21 }
 0x798   : > { %v1978_v32 = vmul.f32 %v4091_v23, %v4049_v0  ;;  %v3441_v38 = vpop.eup %3440  ;;  %v1996_v39 = vadd.f32 %v4058_v6, %v1995_v15  ;;  %vm1983_vm11 = vweird.f32 %v4091_v23  ;;  %vm2077_vm4 = vcmp.eq.f32.partialorder %v2076_v9, 8.507059e+37  ;;  %v1898_v0 = vpop.f32.mrf.mxu3 }
 0x799   : > { %v4111_v8 = vpop.eup %3442  ;;  %v2011_v43 = vadd.f32 %v4063_v12, %v2010_v26  ;;  %v4148_v61 = vadd.f32 1.0, %v3441_v38  ;;  %v2033_v40 = vand.u32 2147483648, %v4061_v10 }
 0x79a   : > { %v3445_v44 = vpop.eup %3444  ;;  %v1979_v49 = vsub.f32 1.0, %v1978_v32  ;;  %v2000_v57 = vsel %vm4126_vm7, %v4058_v6, %v1996_v39  ;;  %v2023_v60 = vmul.f32 %v4111_v8, %v4061_v10  ;;  %v2063_v6 = vand.u32 2147483648, %v4077_v20 }
 0x79b   : > { %v2053_v33 = vmul.f32 %v3445_v44, %v4077_v20  ;;  %v2015_v63 = vsel %vm4140_vm8, %v4063_v12, %v2011_v43  ;;  %3450 = vrcp.f32 %v4148_v61  ;;  %v2005_v14 = vsel %vm4113_vm3, %v2004_v45, %v2000_v57  ;;  %vm4184_vm3 = vmor %vm1982_vm9, %vm1983_vm11 }
 0x79c   : > { %v3447_v56 = vpop.eup %3446  ;;  %v1980_v5 = vmul.f32 %v4091_v23, %v1979_v49  ;;  %vm2058_vm12 = vweird.f32 %v3445_v44  ;;  %v2020_v62 = vsel %vm4120_vm6, %v2019_v48, %v2015_v63  ;;  %v2024_v17 = vsub.f32 1.0, %v2023_v60 }
 0x79d   : > { %v2054_v2 = vsub.f32 1.0, %v2053_v33  ;;  %v2068_v3 = vmul.f32 %v3447_v56, %v4083_v21  ;;  %v3449_v4 = vpop.eup %3448  ;;  %vm2073_vm14 = vweird.f32 %v3447_v56  ;;  %vm2059_vm15 = vmor %vm2057_vm10, %vm2058_vm12  ;;  %v2064_v18 = vor.u32 1.1754944e-38, %v2063_v6 }
 0x79e   : > { %v4169_v22 = vadd.f32 1.0, %v3449_v4  ;;  %v1981_v24 = vadd.f32 %v4091_v23, %v1980_v5  ;;  %v2098_v26 = vmul.f32 %v2005_v14, %v3975_v28  ;;  %v2099_v35 = vmul.f32 %v2020_v62, %v3978_v31  ;;  %vm2074_vm2 = vmor %vm2072_vm1, %vm2073_vm14 }
 0x79f   : > { %v2055_v16 = vmul.f32 %v3445_v44, %v2054_v2  ;;  %v2069_v12 = vsub.f32 1.0, %v2068_v3  ;;  %v2025_v36 = vmul.f32 %v4111_v8, %v2024_v17  ;;  %v2079_v20 = vor.u32 1.1754944e-38, %v2078_v1 }
 0x7a0   : > { %3452 = vrcp.f32 %v4169_v22  ;;  %v1985_v39 = vsel %vm4184_vm3, %v4091_v23, %v1981_v24  ;;  %vm2028_vm5 = vweird.f32 %v4111_v8  ;;  %v2106_v48 = vmul.f32 %v2098_v26, %v1912_v11  ;;  %v1928_v23 = vpop.f32.mrf.mxu1  ;;  %v1900_v9 = vpop.f32.mrf.mxu3 }
 0x7a1   : > { %v2056_v59 = vadd.f32 %v3445_v44, %v2055_v16  ;;  %v2070_v15 = vmul.f32 %v3447_v56, %v2069_v12  ;;  %v3451_v32 = vpop.eup %3450  ;;  %v2026_v49 = vadd.f32 %v4111_v8, %v2025_v36  ;;  %v2046_v50 = vand.u32 2147483647, %v4148_v61 }
 0x7a2   : > { %v2038_v31 = vmul.f32 %v3451_v32, %v4148_v61  ;;  %v2048_v51 = vand.u32 2147483648, %v4148_v61  ;;  %v2107_v33 = vmul.f32 %v2099_v35, %v1926_v13  ;;  %vm2043_vm6 = vweird.f32 %v3451_v32 }
 0x7a3   : > { %v2060_v27 = vsel %vm2059_vm15, %v3445_v44, %v2056_v59  ;;  %v2071_v29 = vadd.f32 %v3447_v56, %v2070_v15  ;;  %v1914_v44 = vpop.f32.mrf.mxu0  ;;  %vm2027_vm7 = vweird.f32 %v4061_v10  ;;  %vm4212_vm9 = vcmp.eq.f32.partialorder %v2031_v55, 8.507059e+37 }
 0x7a4   : > { %v2065_v37 = vsel %vm2062_vm0, %v2064_v18, %v2060_v27  ;;  %v2039_v47 = vsub.f32 1.0, %v2038_v31  ;;  %vm4206_vm8 = vmor %vm2027_vm7, %vm2028_vm5  ;;  %vm2042_vm10 = vweird.f32 %v4148_v61  ;;  %v2034_v5 = vor.u32 1.1754944e-38, %v2033_v40 }
 0x7a5   : > { %v2102_v28 = vmul.f32 %v2065_v37, %v4011_v46  ;;  %v2075_v38 = vsel %vm2074_vm2, %v3447_v56, %v2071_v29  ;;  %v2030_v4 = vsel %vm4206_vm8, %v4111_v8, %v2026_v49  ;;  %vm2044_vm11 = vmor %vm2042_vm10, %vm2043_vm6  ;;  %v2049_v6 = vor.u32 1.1754944e-38, %v2048_v51 }
 0x7a6   : > { %v2080_v43 = vsel %vm2077_vm4, %v2079_v20, %v2075_v38  ;;  %v3453_v56 = vpop.eup %3452  ;;  %v2040_v57 = vmul.f32 %v3451_v32, %v2039_v47  ;;  %vm2047_vm12 = vcmp.eq.f32.partialorder %v2046_v50, 8.507059e+37  ;;  %v2093_v14 = vand.u32 2147483648, %v4169_v22 }
 0x7a7   : > { %v2103_v45 = vmul.f32 %v2080_v43, %v4014_v25  ;;  %v2110_v46 = vmul.f32 %v2102_v28, %v1914_v44  ;;  %v1990_v25 = vsel %vm4165_vm13, %v4131_v53, %v1985_v39  ;;  %v2083_v11 = vmul.f32 %v3453_v56, %v4169_v22  ;;  %v1940_v53 = vpop.f32.mrf.mxu2 }
 0x7a8   : > { %v2041_v54 = vadd.f32 %v3451_v32, %v2040_v57  ;;  %v2097_v10 = vmul.f32 %v1990_v25, %v3999_v41  ;;  %vm2088_vm13 = vweird.f32 %v3453_v56  ;;  %v2091_v12 = vand.u32 2147483647, %v4169_v22 }
 0x7a9   : > { %v2178_v52 = vpack.c.bf16 %v2110_v46, %v2106_v48  ;;  %v2111_v60 = vmul.f32 %v2103_v45, %v1928_v23  ;;  %v2084_v13 = vsub.f32 1.0, %v2083_v11  ;;  %v2035_v8 = vsel %vm4212_vm9, %v2034_v5, %v2030_v4 }
 0x7aa   : > { %v2045_v55 = vsel %vm2044_vm11, %v3451_v32, %v2041_v54  ;;  %vm2087_vm14 = vweird.f32 %v4169_v22  ;;  %v2094_v41 = vor.u32 1.1754944e-38, %v2093_v14  ;;  %v2105_v1 = vmul.f32 %v2097_v10, %v1898_v0 }
 0x7ab   : > { %v2179_v3 = vpack.c.bf16 %v2111_v60, %v2107_v33  ;;  %2395 = vmatmul.bf16.vlgmr.msrb.gmra.mxu0 %v2178_v52  ;;  %v2050_v61 = vsel %vm2047_vm12, %v2049_v6, %v2045_v55  ;;  %v2085_v16 = vmul.f32 %v3453_v56, %v2084_v13  ;;  %vm2089_vm15 = vmor %vm2087_vm14, %vm2088_vm13  ;;  %v2100_v59 = vmul.f32 %v2035_v8, %v4002_v42 }
 0x7ac   : > { %v2101_v62 = vmul.f32 %v2050_v61, %v4041_v58  ;;  %vm2092_vm0 = vcmp.eq.f32.partialorder %v2091_v12, 8.507059e+37 }
 0x7ad   : > { %2409 = vmatmul.bf16.vlgmr.msra.gmra.mxu1 %v2179_v3  ;;  %v2086_v17 = vadd.f32 %v3453_v56, %v2085_v16  ;;  %v2108_v58 = vmul.f32 %v2100_v59, %v1940_v53 }
 0x7ae   : > { %v2109_v7 = vmul.f32 %v2101_v62, %v1900_v9 }
 0x7af   : > { %v2090_v15 = vsel %vm2089_vm15, %v3453_v56, %v2086_v17  ;;  %v1942_v27 = vpop.f32.mrf.mxu2 }
 0x7b0   : > { %v2095_v24 = vsel %vm2092_vm0, %v2094_v41, %v2090_v15  ;;  %v2177_v18 = vpack.c.bf16 %v2109_v7, %v2105_v1 }
 0x7b1   : > { %v2104_v26 = vmul.f32 %v2095_v24, %v4075_v19 }
 0x7b2   : > { %2381 = vmatmul.bf16.vlgmr.msra.gmra.mxu3 %v2177_v18 }
 0x7b3   : > { %v2112_v29 = vmul.f32 %v2104_v26, %v1942_v27 }
 0x7b5   : > { %v2180_v22 = vpack.c.bf16 %v2112_v29, %v2108_v58 }
 0x7b7   : > { %2423 = vmatmul.bf16.vlgmr.msrb.gmra.mxu2 %v2180_v22 }
 0x828   : > { %v2396_v32 = vpop.f32.mrf.mxu0 }
 0x82a   : > { %v2410_v35 = vpop.f32.mrf.mxu1 }
 0x830   : > { %v2398_v28 = vpop.f32.mrf.mxu0 }
 0x832   : > { %v2412_v39 = vpop.f32.mrf.mxu1 }
 0x835   : > { %v2382_v36 = vpop.f32.mrf.mxu3 }
 0x836   : > { %v2397_v37 = vadd.f32 %v2396_v32, %v2382_v36 }
 0x838   : > { %v2411_v42 = vadd.f32 %v2410_v35, %v2397_v37 }
 0x83a   : > { %v2424_v20 = vpop.f32.mrf.mxu2 }
 0x83b   : > { %v2425_v21 = vadd.f32 %v2424_v20, %v2411_v42 }
 0x83d   : > { %v2429_v19 = vadd.f32 %v2425_v21, %v3917_v30  ;;  %v2384_v38 = vpop.f32.mrf.mxu3 }
 0x83e   : > { %v2399_v31 = vadd.f32 %v2398_v28, %v2384_v38 }
 0x83f   : > { %2431 = vst [vmem:[%s468_s15] sm:$0xff] %v2429_v19 }
 0x840   : > { %v2413_v40 = vadd.f32 %v2412_v39, %v2399_v31 }
 0x842   : > { %v2426_v43 = vpop.f32.mrf.mxu2 }
 0x843   : > { %v2427_v0 = vadd.f32 %v2426_v43, %v2413_v40 }
 0x845   : > { %v2430_v44 = vadd.f32 %v2427_v0, %v3921_v34 }
 0x847   : > { %2432 = vst [vmem:[%s468_s15 + $0x8] sm:$0xff] %v2430_v44 }
 0x848   : > { %3543 = shalt.err (!%p3540_p8)
}
 0x849   : > { %s3598_s27 = smov 128   ;;  %s3599_s15 = smov 8  }
 0x84a   : > { %3254 = dma.vmem_to_hbm [thread:$0]  (%p3708_p5), %s2447_s20, 256, %s2449_s23, %s2434_s29, %s3598_s27, %s3598_s27, %s3599_s15  }
 0x84b PF: > { %p3271_p9 = scmp.ge.s32.totalorder %s3586_s28, 2  ;;  %s2463_s21 = sand.u32 1, %s3574_s25  }
 0x84c   : > { %s2464_s30 = scalar_lea.sflag [#allocation4], %s2463_s21 }
 0x84d   : > { %p3264_p10 = pnand %p3271_p9, %p3712_p6 }
 0x84f   : > { %p3265_p11 = pneg %p3264_p10 }
 0x851   : > { %3569 = dma.done.wait (%p3265_p11), %s2464_s30, 256  }
 0x852   : > { %3571 = vsyncadd (%p3265_p11), %s2464_s30, 4294967040  ;;  %s4308_s28 = sld [smem:[#allocation12_spill]]  ;;  %s4311_s25 = smov %s3578_s26 }
 0x853   : > { %s4309_s24 = sld [smem:[#allocation11_spill]] }
 0x854   : > { %s4310_s27 = sld [smem:[#allocation13_spill]] }
 0x858   : > { %p25_p12 = scmp.ge.s32.totalorder %s4308_s28, 4  }
 0x859   : > { %s4312_s26 = smov %s4309_s24 }
 0x85a   :  { %27 = sbr.rel (!%p25_p12) target bundleno = 7 (0x7), region = 116 }
 0x85f   :  { %2470 = vsyncpa [#allocation3], 1 }
 0x860   :  { %2472 = vsyncpa [#allocation3 + $0x1], 1 }
 0x861   :  { %2473 = vsyncpa [#allocation6], 1 }
 0x862   :  { %2474 = vsyncpa [#allocation4], 1 }
 0x863   :  { %2476 = vsyncpa [#allocation4 + $0x1], 1 }

</bundles_post_ra>
